<compile_context>
chip_gen: v7x
topology: tpu7x:2x2x1
jax: 0.10.0
libtpu: 0.0.40
codegen_flags: <defaults>
</compile_context>

<pallas_src>
import jax
import jax.numpy as jnp
from jax import lax
from jax.experimental import pallas as pl
from jax.experimental.pallas import tpu as pltpu


def _make_lstm_kernel(seq_len, seq_pad, chunk, batch_pad, hidden_pad,
                      n_chunks, unroll):
    """Build the skewed, chunked LSTM kernel for static geometry."""
    Tc, Bp, Hp = chunk, batch_pad, hidden_pad
    G = 4 * Hp

    def kernel(x_ref, wx_ref, wh_ref, b_ref, h0_ref, c0_ref,
               out_ref, hN_ref, cN_ref, xp_sc, h_sc, c_sc):
        t = pl.program_id(0)                      # grid = n_chunks + 1 steps

        # Initialize the recurrent carry on the first grid step.
        @pl.when(t == 0)
        def _():
            h_sc[...] = h0_ref[...]
            c_sc[...] = c0_ref[...]

        # ---- Skewed input projection ------------------------------------
        # Project chunk t into ping-pong slot (t % 2) while the recurrence
        # below consumes chunk t-1 from the other slot.  One (Tc*Bp, I) @
        # (I, 4Hp) bf16 GEMM with f32 accumulation; combined bias added once
        # per chunk (not per step / per gate).
        @pl.when(t < n_chunks)
        def _():
            xp = jnp.dot(x_ref[...], wx_ref[...],
                         preferred_element_type=jnp.float32) + b_ref[...]
            xp_sc[t % 2] = xp
        # TODO(synk): if Mosaic orders the ping-pong store/load conservatively
        # (cannot disambiguate the dynamic slots), split the projection on
        # grid-step parity into two statically-indexed pl.when branches.

        # ---- Serial recurrence over chunk t-1 -----------------------------
        @pl.when(t >= 1)
        def _():
            wh = wh_ref[...]                      # resident packed (Hp, 4Hp) f32
            xp_view = xp_sc.at[(t - 1) % 2]       # (Tc*Bp, 4Hp) f32 view

            def step(s, carry):
                h_prev, c_prev = carry
                r0 = pl.multiple_of(s * Bp, Bp)
                # Only this (Bp, Hp) @ (Hp, 4Hp) matmul sits on the serial
                # critical path; f32 operands -> no per-step cast of h.
                gates = xp_view[pl.ds(r0, Bp), :] + jnp.dot(
                    h_prev, wh, preferred_element_type=jnp.float32)
                # Gate order (i, f, o, g): one lane-aligned sigmoid pass over
                # the first three gates, tanh on the last.
                sig = jax.nn.sigmoid(gates[:, :3 * Hp])
                i_t = sig[:, 0 * Hp:1 * Hp]
                f_t = sig[:, 1 * Hp:2 * Hp]
                o_t = sig[:, 2 * Hp:3 * Hp]
                g_t = jnp.tanh(gates[:, 3 * Hp:])
                c_new = f_t * c_prev + i_t * g_t
                h_new = o_t * jnp.tanh(c_new)
                if seq_pad != seq_len:            # static: ragged tail only
                    valid = (t - 1) * Tc + s < seq_len
                    c_new = jnp.where(valid, c_new, c_prev)
                    h_new = jnp.where(valid, h_new, h_prev)
                # Lane-dense (Hp % 128 == 0), contiguous-sublane store.
                out_ref[pl.ds(r0, Bp), :] = h_new.astype(out_ref.dtype)
                return h_new, c_new

            h_last, c_last = lax.fori_loop(
                0, Tc, step, (h_sc[...], c_sc[...]), unroll=unroll)
            # Write the carry back once per chunk.
            h_sc[...] = h_last
            c_sc[...] = c_last

        @pl.when(t == n_chunks)
        def _():
            hN_ref[...] = h_sc[...].astype(hN_ref.dtype)
            cN_ref[...] = c_sc[...].astype(cN_ref.dtype)

    return kernel


def lstm_forward(inputs, hidden_states, params, *,
                 time_chunk=None, matmul_dtype=jnp.bfloat16):
    """inputs: (B, S, I) f32; hidden_states: (h, c) each (1, B, H) f32."""
    h0, c0 = hidden_states
    B, S, I = inputs.shape
    H = h0.shape[-1]

    Bp = max(8, ((B + 7) // 8) * 8)               # batch -> sublane multiple
    Hp = ((H + 127) // 128) * 128                 # hidden -> lane multiple
    G = 4 * Hp
    Tc = time_chunk if time_chunk is not None else min(S, 64)
    Sp = ((S + Tc - 1) // Tc) * Tc
    n_chunks = Sp // Tc
    unroll = min(Tc, 8)                           # partial unroll (cap vregs)

    # ---- Pack gate weights, order (i, f, o, g), pad H -> Hp ----------------
    def pad_cols(w):   # (H, X) -> (X, Hp)
        return jnp.pad(w.T, ((0, 0), (0, Hp - H)))

    def pad_sq(w):     # (H, H) -> (Hp, Hp)
        return jnp.pad(w.T, ((0, Hp - H), (0, Hp - H)))

    def pad_b(bi, bh):  # fold both bias sets, pad to Hp
        return jnp.pad(bi + bh, (0, Hp - H))

    wx = jnp.concatenate([pad_cols(params["w_ii"]), pad_cols(params["w_if"]),
                          pad_cols(params["w_io"]), pad_cols(params["w_ig"])],
                         axis=1).astype(matmul_dtype)            # (I, 4Hp)
    wh = jnp.concatenate([pad_sq(params["w_hi"]), pad_sq(params["w_hf"]),
                          pad_sq(params["w_ho"]), pad_sq(params["w_hg"])],
                         axis=1).astype(jnp.float32)             # (Hp, 4Hp)
    b = jnp.concatenate([pad_b(params["b_ii"], params["b_hi"]),
                         pad_b(params["b_if"], params["b_hf"]),
                         pad_b(params["b_io"], params["b_ho"]),
                         pad_b(params["b_ig"], params["b_hg"])]
                        )[None, :].astype(jnp.float32)           # (1, 4Hp)

    # Time-major, batch-padded, flattened input: each grid step reads one
    # contiguous (Tc*Bp, I) row chunk (keeps every per-step access a clean
    # contiguous-sublane slice with zero relayout on the critical path).
    x = jnp.transpose(inputs, (1, 0, 2)).astype(matmul_dtype)    # (S, B, I)
    x = jnp.pad(x, ((0, Sp - S), (0, Bp - B), (0, 0)))
    x2d = x.reshape(Sp * Bp, I)

    h0b = jnp.pad(h0[0].astype(jnp.float32), ((0, Bp - B), (0, Hp - H)))
    c0b = jnp.pad(c0[0].astype(jnp.float32), ((0, Bp - B), (0, Hp - H)))

    # ---- VMEM budget derived from actual buffer sizes ----------------------
    itemsize = jnp.dtype(matmul_dtype).itemsize
    vmem_bytes = (
        2 * Tc * Bp * I * itemsize        # x chunk (double-buffered)
        + 2 * I * G * itemsize            # packed Wx
        + 2 * Hp * G * 4                  # packed Wh (f32)
        + 2 * G * 4                       # combined bias
        + 4 * Bp * Hp * 4                 # h0, c0
        + 2 * Tc * Bp * Hp * 4            # out chunk
        + 4 * Bp * Hp * 4                 # final h, c
        + 2 * Tc * Bp * G * 4             # xp ping-pong scratch
        + 2 * Bp * Hp * 4)                # h/c carry scratch
    vmem_limit = min(64 * 1024 * 1024,
                     max(16 * 1024 * 1024, int(1.5 * vmem_bytes) + (4 << 20)))

    last_chunk = n_chunks - 1
    grid_spec = pltpu.PrefetchScalarGridSpec(
        num_scalar_prefetch=0,
        grid=(n_chunks + 1,),             # +1: skewed projection/recurrence
        in_specs=[
            pl.BlockSpec((Tc * Bp, I),
                         lambda t: (jnp.minimum(t, last_chunk), 0)),  # x chunk
            pl.BlockSpec((I, G), lambda t: (0, 0)),    # packed Wx (resident)
            pl.BlockSpec((Hp, G), lambda t: (0, 0)),   # packed Wh (resident)
            pl.BlockSpec((1, G), lambda t: (0, 0)),    # combined bias
            pl.BlockSpec((Bp, Hp), lambda t: (0, 0)),  # h0
            pl.BlockSpec((Bp, Hp), lambda t: (0, 0)),  # c0
        ],
        out_specs=(
            pl.BlockSpec((Tc * Bp, Hp),
                         lambda t: (jnp.maximum(t - 1, 0), 0)),  # per-step h
            pl.BlockSpec((Bp, Hp), lambda t: (0, 0)),            # final h
            pl.BlockSpec((Bp, Hp), lambda t: (0, 0)),            # final c
        ),
        scratch_shapes=[
            pltpu.VMEM((2, Tc * Bp, G), jnp.float32),  # xp ping-pong buffer
            pltpu.VMEM((Bp, Hp), jnp.float32),         # h carry
            pltpu.VMEM((Bp, Hp), jnp.float32),         # c carry
        ],
    )

    out2d, h_last, c_last = pl.pallas_call(
        _make_lstm_kernel(S, Sp, Tc, Bp, Hp, n_chunks, unroll),
        out_shape=(
            jax.ShapeDtypeStruct((Sp * Bp, Hp), jnp.float32),
            jax.ShapeDtypeStruct((Bp, Hp), jnp.float32),
            jax.ShapeDtypeStruct((Bp, Hp), jnp.float32),
        ),
        grid_spec=grid_spec,
        compiler_params=pltpu.CompilerParams(
            dimension_semantics=("arbitrary",),   # strict sequential recurrence
            vmem_limit_bytes=vmem_limit,
        ),
    )(x2d, wx, wh, b, h0b, c0b)

    out = out2d.reshape(Sp, Bp, Hp)[:S, :B, :H]
    outputs = jnp.transpose(out, (1, 0, 2))                    # (B, S, H)
    return outputs, (h_last[None, :B, :H], c_last[None, :B, :H])


def init_lstm_params(key, input_size, hidden_size):
    bound = (1.0 / hidden_size) ** 0.5
    names_shapes = [
        ("w_ii", (hidden_size, input_size)), ("w_if", (hidden_size, input_size)),
        ("w_ig", (hidden_size, input_size)), ("w_io", (hidden_size, input_size)),
        ("b_ii", (hidden_size,)), ("b_if", (hidden_size,)),
        ("b_ig", (hidden_size,)), ("b_io", (hidden_size,)),
        ("w_hi", (hidden_size, hidden_size)), ("w_hf", (hidden_size, hidden_size)),
        ("w_hg", (hidden_size, hidden_size)), ("w_ho", (hidden_size, hidden_size)),
        ("b_hi", (hidden_size,)), ("b_hf", (hidden_size,)),
        ("b_hg", (hidden_size,)), ("b_ho", (hidden_size,)),
    ]
    params = {}
    keys = jax.random.split(key, len(names_shapes))
    for k, (name, shape) in zip(keys, names_shapes):
        params[name] = jax.random.uniform(
            k, shape, minval=-bound, maxval=bound, dtype=jnp.float32)
    return params


def lstm_reference(inputs, hidden_states, params):
    """Pure-JAX (f32) reference of the PyTorch forward for validation."""
    h, c = hidden_states[0][0], hidden_states[1][0]
    S = inputs.shape[1]
    outs = []
    for t in range(S):
        x_t = inputs[:, t, :]
        i_t = jax.nn.sigmoid(x_t @ params["w_ii"].T + params["b_ii"]
                             + h @ params["w_hi"].T + params["b_hi"])
        f_t = jax.nn.sigmoid(x_t @ params["w_if"].T + params["b_if"]
                             + h @ params["w_hf"].T + params["b_hf"])
        g_t = jnp.tanh(x_t @ params["w_ig"].T + params["b_ig"]
                       + h @ params["w_hg"].T + params["b_hg"])
        o_t = jax.nn.sigmoid(x_t @ params["w_io"].T + params["b_io"]
                             + h @ params["w_ho"].T + params["b_ho"])
        c = f_t * c + i_t * g_t
        h = o_t * jnp.tanh(c)
        outs.append(h[:, None, :])
    return jnp.concatenate(outs, axis=1), (h[None], c[None])


if __name__ == "__main__":
    batch, seq, input_size, hidden_size = 2, 8, 4, 32

    key = jax.random.PRNGKey(0)
    k_param, k_x, k_h, k_c = jax.random.split(key, 4)

    params = init_lstm_params(k_param, input_size, hidden_size)
    x = jax.random.normal(k_x, (batch, seq, input_size), dtype=jnp.float32)
    h0 = jax.random.normal(k_h, (1, batch, hidden_size), dtype=jnp.float32)
    c0 = jax.random.normal(k_c, (1, batch, hidden_size), dtype=jnp.float32)

    out, (h_n, c_n) = lstm_forward(x, (h0, c0), params)
    jax.block_until_ready((out, h_n, c_n))

    # Validate against a pure-JAX f32 reference of the PyTorch semantics.
    # (bf16 input-projection operands with f32 accumulation / f32 recurrence
    #  and carry -> slightly loosened tolerance.)
    out_ref, (h_ref, c_ref) = lstm_reference(x, (h0, c0), params)
    assert out.shape == (batch, seq, hidden_size)
    assert h_n.shape == (1, batch, hidden_size)
    assert c_n.shape == (1, batch, hidden_size)
    assert jnp.allclose(out, out_ref, atol=2e-2, rtol=2e-2)
    assert jnp.allclose(h_n, h_ref, atol=2e-2, rtol=2e-2)
    assert jnp.allclose(c_n, c_ref, atol=2e-2, rtol=2e-2)

    print("KERNEL_OK")
</pallas_src>

<mosaic_0001>
module attributes {stable_mosaic.version = 11 : i64} {
  func.func @kernel(%arg0: i32, %arg1: memref<64x4xbf16, #tpu.memory_space<vmem>>, %arg2: memref<4x512xbf16, #tpu.memory_space<vmem>>, %arg3: memref<128x512xf32, #tpu.memory_space<vmem>>, %arg4: memref<1x512xf32, #tpu.memory_space<vmem>>, %arg5: memref<8x128xf32, #tpu.memory_space<vmem>>, %arg6: memref<8x128xf32, #tpu.memory_space<vmem>>, %arg7: memref<64x128xf32, #tpu.memory_space<vmem>>, %arg8: memref<8x128xf32, #tpu.memory_space<vmem>>, %arg9: memref<8x128xf32, #tpu.memory_space<vmem>>, %arg10: memref<2x64x512xf32, #tpu.memory_space<vmem>>, %arg11: memref<8x128xf32, #tpu.memory_space<vmem>>, %arg12: memref<8x128xf32, #tpu.memory_space<vmem>>) attributes {dimension_semantics = [#tpu.dimension_semantics<arbitrary>], iteration_bounds = array<i64: 2>, scalar_prefetch = 0 : i64, scratch_operands = 3 : i64, tpu.core_type = #tpu.core_type<tc>, window_params = [{transform_indices = @transform_0, window_bounds = array<i64: 64, 4>}, {pipeline_mode = #tpu.pipeline_mode<synchronous>, transform_indices = @transform_1, window_bounds = array<i64: 4, 512>}, {pipeline_mode = #tpu.pipeline_mode<synchronous>, transform_indices = @transform_2, window_bounds = array<i64: 128, 512>}, {pipeline_mode = #tpu.pipeline_mode<synchronous>, transform_indices = @transform_3, window_bounds = array<i64: 1, 512>}, {pipeline_mode = #tpu.pipeline_mode<synchronous>, transform_indices = @transform_4, window_bounds = array<i64: 8, 128>}, {pipeline_mode = #tpu.pipeline_mode<synchronous>, transform_indices = @transform_5, window_bounds = array<i64: 8, 128>}, {transform_indices = @transform_6, window_bounds = array<i64: 64, 128>}, {pipeline_mode = #tpu.pipeline_mode<synchronous>, transform_indices = @transform_7, window_bounds = array<i64: 8, 128>}, {pipeline_mode = #tpu.pipeline_mode<synchronous>, transform_indices = @transform_8, window_bounds = array<i64: 8, 128>}]} {
    %c0_i32 = arith.constant 0 : i32
    %0 = arith.cmpi eq, %arg0, %c0_i32 : i32
    %1 = arith.extui %0 : i1 to i32
    %c0_i32_0 = arith.constant 0 : i32
    %2 = arith.cmpi ne, %1, %c0_i32_0 : i32
    scf.if %2 {
      %c0 = arith.constant 0 : index
      %c0_6 = arith.constant 0 : index
      %12 = vector.load %arg5[%c0, %c0_6] : memref<8x128xf32, #tpu.memory_space<vmem>>, vector<8x128xf32>
      %c0_7 = arith.constant 0 : index
      %c0_8 = arith.constant 0 : index
      %13 = vector.load %arg11[%c0_7, %c0_8] : memref<8x128xf32, #tpu.memory_space<vmem>>, vector<8x128xf32>
      tpu.vector_store %arg11[%c0_7, %c0_8], %12 {strides = array<i32>} : memref<8x128xf32, #tpu.memory_space<vmem>>, vector<8x128xf32>,
      %c0_9 = arith.constant 0 : index
      %c0_10 = arith.constant 0 : index
      %14 = vector.load %arg6[%c0_9, %c0_10] : memref<8x128xf32, #tpu.memory_space<vmem>>, vector<8x128xf32>
      %c0_11 = arith.constant 0 : index
      %c0_12 = arith.constant 0 : index
      %15 = vector.load %arg12[%c0_11, %c0_12] : memref<8x128xf32, #tpu.memory_space<vmem>>, vector<8x128xf32>
      tpu.vector_store %arg12[%c0_11, %c0_12], %14 {strides = array<i32>} : memref<8x128xf32, #tpu.memory_space<vmem>>, vector<8x128xf32>,
    } else {
    }
    %c1_i32 = arith.constant 1 : i32
    %3 = arith.cmpi slt, %arg0, %c1_i32 : i32
    %4 = arith.extui %3 : i1 to i32
    %c0_i32_1 = arith.constant 0 : i32
    %5 = arith.cmpi ne, %4, %c0_i32_1 : i32
    scf.if %5 {
      %c0 = arith.constant 0 : index
      %c0_6 = arith.constant 0 : index
      %12 = vector.load %arg1[%c0, %c0_6] : memref<64x4xbf16, #tpu.memory_space<vmem>>, vector<64x4xbf16>
      %c0_7 = arith.constant 0 : index
      %c0_8 = arith.constant 0 : index
      %13 = vector.load %arg2[%c0_7, %c0_8] : memref<4x512xbf16, #tpu.memory_space<vmem>>, vector<4x512xbf16>
      %cst = arith.constant dense<0.000000e+00> : vector<64x512xf32>
      %14 = tpu.matmul %12, %13, %cst {dimension_numbers = #tpu.dot_dimension_numbers<[1], [0], [0], [1], [0, 0, 1, 1], [], []>} : vector<64x4xbf16>, vector<4x512xbf16>, vector<64x512xf32> -> vector<64x512xf32>
      %c0_9 = arith.constant 0 : index
      %c0_10 = arith.constant 0 : index
      %15 = vector.load %arg4[%c0_9, %c0_10] : memref<1x512xf32, #tpu.memory_space<vmem>>, vector<1x512xf32>
      %16 = vector.broadcast %15 : vector<1x512xf32> to vector<64x512xf32>
      %17 = arith.addf %14, %16 : vector<64x512xf32>
      %c2_i32 = arith.constant 2 : i32
      %c0_i32_11 = arith.constant 0 : i32
      %18 = arith.cmpi eq, %c2_i32, %c0_i32_11 : i32
      %c1_i32_12 = arith.constant 1 : i32
      %19 = arith.select %18, %c1_i32_12, %c2_i32 : i32
      %20 = arith.remsi %arg0, %19 : i32
      %c0_i32_13 = arith.constant 0 : i32
      %21 = arith.cmpi ne, %20, %c0_i32_13 : i32
      %c0_i32_14 = arith.constant 0 : i32
      %22 = arith.cmpi slt, %20, %c0_i32_14 : i32
      %c0_i32_15 = arith.constant 0 : i32
      %23 = arith.cmpi slt, %19, %c0_i32_15 : i32
      %24 = arith.xori %22, %23 : i1
      %25 = arith.andi %24, %21 : i1
      %26 = arith.addi %20, %19 : i32
      %27 = arith.select %25, %26, %20 : i32
      %28 = arith.index_cast %27 : i32 to index
      %c0_16 = arith.constant 0 : index
      %c0_17 = arith.constant 0 : index
      %29 = vector.load %arg10[%28, %c0_16, %c0_17] : memref<2x64x512xf32, #tpu.memory_space<vmem>>, vector<1x64x512xf32>
      %30 = vector.shape_cast %29 : vector<1x64x512xf32> to vector<64x512xf32>
      %31 = vector.shape_cast %17 : vector<64x512xf32> to vector<1x64x512xf32>
      tpu.vector_store %arg10[%28, %c0_16, %c0_17], %31 {strides = array<i32>} : memref<2x64x512xf32, #tpu.memory_space<vmem>>, vector<1x64x512xf32>,
    } else {
    }
    %c1_i32_2 = arith.constant 1 : i32
    %6 = arith.cmpi sge, %arg0, %c1_i32_2 : i32
    %7 = arith.extui %6 : i1 to i32
    %c0_i32_3 = arith.constant 0 : i32
    %8 = arith.cmpi ne, %7, %c0_i32_3 : i32
    scf.if %8 {
      %c0 = arith.constant 0 : index
      %c0_6 = arith.constant 0 : index
      %12 = vector.load %arg3[%c0, %c0_6] : memref<128x512xf32, #tpu.memory_space<vmem>>, vector<128x512xf32>
      %c1_i32_7 = arith.constant 1 : i32
      %13 = arith.subi %arg0, %c1_i32_7 : i32
      %c2_i32 = arith.constant 2 : i32
      %c0_i32_8 = arith.constant 0 : i32
      %14 = arith.cmpi eq, %c2_i32, %c0_i32_8 : i32
      %c1_i32_9 = arith.constant 1 : i32
      %15 = arith.select %14, %c1_i32_9, %c2_i32 : i32
      %16 = arith.remsi %13, %15 : i32
      %c0_i32_10 = arith.constant 0 : i32
      %17 = arith.cmpi ne, %16, %c0_i32_10 : i32
      %c0_i32_11 = arith.constant 0 : i32
      %18 = arith.cmpi slt, %16, %c0_i32_11 : i32
      %c0_i32_12 = arith.constant 0 : i32
      %19 = arith.cmpi slt, %15, %c0_i32_12 : i32
      %20 = arith.xori %18, %19 : i1
      %21 = arith.andi %20, %17 : i1
      %22 = arith.addi %16, %15 : i32
      %23 = arith.select %21, %22, %16 : i32
      %c0_13 = arith.constant 0 : index
      %c0_14 = arith.constant 0 : index
      %24 = vector.load %arg11[%c0_13, %c0_14] : memref<8x128xf32, #tpu.memory_space<vmem>>, vector<8x128xf32>
      %c0_15 = arith.constant 0 : index
      %c0_16 = arith.constant 0 : index
      %25 = vector.load %arg12[%c0_15, %c0_16] : memref<8x128xf32, #tpu.memory_space<vmem>>, vector<8x128xf32>
      %c0_i32_17 = arith.constant 0 : i32
      %c8_i32 = arith.constant 8 : i32
      %26 = arith.muli %c0_i32_17, %c8_i32 : i32
      %27 = tpu.assume_multiple %26, 8 : i32
      %c0_i32_18 = arith.constant 0 : i32
      %c0_i32_19 = arith.constant 0 : i32
      %28 = tpu.memref_slice %arg10[%23, %c0_i32_18, %c0_i32_19] : memref<2x64x512xf32, #tpu.memory_space<vmem>> -> memref<1x64x512xf32, #tpu.memory_space<vmem>>
      %29 = tpu.memref_squeeze %28 : memref<1x64x512xf32, #tpu.memory_space<vmem>> -> memref<64x512xf32, #tpu.memory_space<vmem>>
      %30 = arith.index_cast %27 : i32 to index
      %c0_20 = arith.constant 0 : index
      %31 = vector.load %29[%30, %c0_20] : memref<64x512xf32, #tpu.memory_space<vmem>>, vector<8x512xf32>
      %cst = arith.constant dense<0.000000e+00> : vector<8x512xf32>
      %32 = tpu.matmul %24, %12, %cst {dimension_numbers = #tpu.dot_dimension_numbers<[1], [0], [0], [1], [0, 0, 1, 1], [], []>} : vector<8x128xf32>, vector<128x512xf32>, vector<8x512xf32> -> vector<8x512xf32>
      %33 = arith.addf %31, %32 : vector<8x512xf32>
      %34 = vector.extract_strided_slice %33 {offsets = [0, 0], sizes = [8, 384], strides = [1, 1]} : vector<8x512xf32> to vector<8x384xf32>
      %35 = arith.negf %34 : vector<8x384xf32>
      %36 = math.exp %35 : vector<8x384xf32>
      %cst_21 = arith.constant 1.000000e+00 : f32
      %37 = vector.broadcast %cst_21 : f32 to vector<8x384xf32>
      %38 = arith.addf %37, %36 : vector<8x384xf32>
      %39 = arith.divf %37, %38 : vector<8x384xf32>
      %40 = vector.extract_strided_slice %39 {offsets = [0, 0], sizes = [8, 128], strides = [1, 1]} : vector<8x384xf32> to vector<8x128xf32>
      %41 = vector.extract_strided_slice %39 {offsets = [0, 128], sizes = [8, 128], strides = [1, 1]} : vector<8x384xf32> to vector<8x128xf32>
      %42 = vector.extract_strided_slice %39 {offsets = [0, 256], sizes = [8, 128], strides = [1, 1]} : vector<8x384xf32> to vector<8x128xf32>
      %43 = vector.extract_strided_slice %33 {offsets = [0, 384], sizes = [8, 128], strides = [1, 1]} : vector<8x512xf32> to vector<8x128xf32>
      %44 = math.tanh %43 : vector<8x128xf32>
      %45 = arith.mulf %41, %25 : vector<8x128xf32>
      %46 = arith.mulf %40, %44 : vector<8x128xf32>
      %47 = arith.addf %45, %46 : vector<8x128xf32>
      %48 = math.tanh %47 : vector<8x128xf32>
      %49 = arith.mulf %42, %48 : vector<8x128xf32>
      %50 = arith.index_cast %27 : i32 to index
      %c0_22 = arith.constant 0 : index
      %51 = vector.load %arg7[%50, %c0_22] : memref<64x128xf32, #tpu.memory_space<vmem>>, vector<8x128xf32>
      tpu.vector_store %arg7[%50, %c0_22], %49 {strides = array<i32>} : memref<64x128xf32, #tpu.memory_space<vmem>>, vector<8x128xf32>,
      %c1_i32_23 = arith.constant 1 : i32
      %c8_i32_24 = arith.constant 8 : i32
      %52 = arith.muli %c1_i32_23, %c8_i32_24 : i32
      %53 = tpu.assume_multiple %52, 8 : i32
      %c0_i32_25 = arith.constant 0 : i32
      %c0_i32_26 = arith.constant 0 : i32
      %54 = tpu.memref_slice %arg10[%23, %c0_i32_25, %c0_i32_26] : memref<2x64x512xf32, #tpu.memory_space<vmem>> -> memref<1x64x512xf32, #tpu.memory_space<vmem>>
      %55 = tpu.memref_squeeze %54 : memref<1x64x512xf32, #tpu.memory_space<vmem>> -> memref<64x512xf32, #tpu.memory_space<vmem>>
      %56 = arith.index_cast %53 : i32 to index
      %c0_27 = arith.constant 0 : index
      %57 = vector.load %55[%56, %c0_27] : memref<64x512xf32, #tpu.memory_space<vmem>>, vector<8x512xf32>
      %cst_28 = arith.constant dense<0.000000e+00> : vector<8x512xf32>
      %58 = tpu.matmul %49, %12, %cst_28 {dimension_numbers = #tpu.dot_dimension_numbers<[1], [0], [0], [1], [0, 0, 1, 1], [], []>} : vector<8x128xf32>, vector<128x512xf32>, vector<8x512xf32> -> vector<8x512xf32>
      %59 = arith.addf %57, %58 : vector<8x512xf32>
      %60 = vector.extract_strided_slice %59 {offsets = [0, 0], sizes = [8, 384], strides = [1, 1]} : vector<8x512xf32> to vector<8x384xf32>
      %61 = arith.negf %60 : vector<8x384xf32>
      %62 = math.exp %61 : vector<8x384xf32>
      %cst_29 = arith.constant 1.000000e+00 : f32
      %63 = vector.broadcast %cst_29 : f32 to vector<8x384xf32>
      %64 = arith.addf %63, %62 : vector<8x384xf32>
      %65 = arith.divf %63, %64 : vector<8x384xf32>
      %66 = vector.extract_strided_slice %65 {offsets = [0, 0], sizes = [8, 128], strides = [1, 1]} : vector<8x384xf32> to vector<8x128xf32>
      %67 = vector.extract_strided_slice %65 {offsets = [0, 128], sizes = [8, 128], strides = [1, 1]} : vector<8x384xf32> to vector<8x128xf32>
      %68 = vector.extract_strided_slice %65 {offsets = [0, 256], sizes = [8, 128], strides = [1, 1]} : vector<8x384xf32> to vector<8x128xf32>
      %69 = vector.extract_strided_slice %59 {offsets = [0, 384], sizes = [8, 128], strides = [1, 1]} : vector<8x512xf32> to vector<8x128xf32>
      %70 = math.tanh %69 : vector<8x128xf32>
      %71 = arith.mulf %67, %47 : vector<8x128xf32>
      %72 = arith.mulf %66, %70 : vector<8x128xf32>
      %73 = arith.addf %71, %72 : vector<8x128xf32>
      %74 = math.tanh %73 : vector<8x128xf32>
      %75 = arith.mulf %68, %74 : vector<8x128xf32>
      %76 = arith.index_cast %53 : i32 to index
      %c0_30 = arith.constant 0 : index
      %77 = vector.load %arg7[%76, %c0_30] : memref<64x128xf32, #tpu.memory_space<vmem>>, vector<8x128xf32>
      tpu.vector_store %arg7[%76, %c0_30], %75 {strides = array<i32>} : memref<64x128xf32, #tpu.memory_space<vmem>>, vector<8x128xf32>,
      %c2_i32_31 = arith.constant 2 : i32
      %c8_i32_32 = arith.constant 8 : i32
      %78 = arith.muli %c2_i32_31, %c8_i32_32 : i32
      %79 = tpu.assume_multiple %78, 8 : i32
      %c0_i32_33 = arith.constant 0 : i32
      %c0_i32_34 = arith.constant 0 : i32
      %80 = tpu.memref_slice %arg10[%23, %c0_i32_33, %c0_i32_34] : memref<2x64x512xf32, #tpu.memory_space<vmem>> -> memref<1x64x512xf32, #tpu.memory_space<vmem>>
      %81 = tpu.memref_squeeze %80 : memref<1x64x512xf32, #tpu.memory_space<vmem>> -> memref<64x512xf32, #tpu.memory_space<vmem>>
      %82 = arith.index_cast %79 : i32 to index
      %c0_35 = arith.constant 0 : index
      %83 = vector.load %81[%82, %c0_35] : memref<64x512xf32, #tpu.memory_space<vmem>>, vector<8x512xf32>
      %cst_36 = arith.constant dense<0.000000e+00> : vector<8x512xf32>
      %84 = tpu.matmul %75, %12, %cst_36 {dimension_numbers = #tpu.dot_dimension_numbers<[1], [0], [0], [1], [0, 0, 1, 1], [], []>} : vector<8x128xf32>, vector<128x512xf32>, vector<8x512xf32> -> vector<8x512xf32>
      %85 = arith.addf %83, %84 : vector<8x512xf32>
      %86 = vector.extract_strided_slice %85 {offsets = [0, 0], sizes = [8, 384], strides = [1, 1]} : vector<8x512xf32> to vector<8x384xf32>
      %87 = arith.negf %86 : vector<8x384xf32>
      %88 = math.exp %87 : vector<8x384xf32>
      %cst_37 = arith.constant 1.000000e+00 : f32
      %89 = vector.broadcast %cst_37 : f32 to vector<8x384xf32>
      %90 = arith.addf %89, %88 : vector<8x384xf32>
      %91 = arith.divf %89, %90 : vector<8x384xf32>
      %92 = vector.extract_strided_slice %91 {offsets = [0, 0], sizes = [8, 128], strides = [1, 1]} : vector<8x384xf32> to vector<8x128xf32>
      %93 = vector.extract_strided_slice %91 {offsets = [0, 128], sizes = [8, 128], strides = [1, 1]} : vector<8x384xf32> to vector<8x128xf32>
      %94 = vector.extract_strided_slice %91 {offsets = [0, 256], sizes = [8, 128], strides = [1, 1]} : vector<8x384xf32> to vector<8x128xf32>
      %95 = vector.extract_strided_slice %85 {offsets = [0, 384], sizes = [8, 128], strides = [1, 1]} : vector<8x512xf32> to vector<8x128xf32>
      %96 = math.tanh %95 : vector<8x128xf32>
      %97 = arith.mulf %93, %73 : vector<8x128xf32>
      %98 = arith.mulf %92, %96 : vector<8x128xf32>
      %99 = arith.addf %97, %98 : vector<8x128xf32>
      %100 = math.tanh %99 : vector<8x128xf32>
      %101 = arith.mulf %94, %100 : vector<8x128xf32>
      %102 = arith.index_cast %79 : i32 to index
      %c0_38 = arith.constant 0 : index
      %103 = vector.load %arg7[%102, %c0_38] : memref<64x128xf32, #tpu.memory_space<vmem>>, vector<8x128xf32>
      tpu.vector_store %arg7[%102, %c0_38], %101 {strides = array<i32>} : memref<64x128xf32, #tpu.memory_space<vmem>>, vector<8x128xf32>,
      %c3_i32 = arith.constant 3 : i32
      %c8_i32_39 = arith.constant 8 : i32
      %104 = arith.muli %c3_i32, %c8_i32_39 : i32
      %105 = tpu.assume_multiple %104, 8 : i32
      %c0_i32_40 = arith.constant 0 : i32
      %c0_i32_41 = arith.constant 0 : i32
      %106 = tpu.memref_slice %arg10[%23, %c0_i32_40, %c0_i32_41] : memref<2x64x512xf32, #tpu.memory_space<vmem>> -> memref<1x64x512xf32, #tpu.memory_space<vmem>>
      %107 = tpu.memref_squeeze %106 : memref<1x64x512xf32, #tpu.memory_space<vmem>> -> memref<64x512xf32, #tpu.memory_space<vmem>>
      %108 = arith.index_cast %105 : i32 to index
      %c0_42 = arith.constant 0 : index
      %109 = vector.load %107[%108, %c0_42] : memref<64x512xf32, #tpu.memory_space<vmem>>, vector<8x512xf32>
      %cst_43 = arith.constant dense<0.000000e+00> : vector<8x512xf32>
      %110 = tpu.matmul %101, %12, %cst_43 {dimension_numbers = #tpu.dot_dimension_numbers<[1], [0], [0], [1], [0, 0, 1, 1], [], []>} : vector<8x128xf32>, vector<128x512xf32>, vector<8x512xf32> -> vector<8x512xf32>
      %111 = arith.addf %109, %110 : vector<8x512xf32>
      %112 = vector.extract_strided_slice %111 {offsets = [0, 0], sizes = [8, 384], strides = [1, 1]} : vector<8x512xf32> to vector<8x384xf32>
      %113 = arith.negf %112 : vector<8x384xf32>
      %114 = math.exp %113 : vector<8x384xf32>
      %cst_44 = arith.constant 1.000000e+00 : f32
      %115 = vector.broadcast %cst_44 : f32 to vector<8x384xf32>
      %116 = arith.addf %115, %114 : vector<8x384xf32>
      %117 = arith.divf %115, %116 : vector<8x384xf32>
      %118 = vector.extract_strided_slice %117 {offsets = [0, 0], sizes = [8, 128], strides = [1, 1]} : vector<8x384xf32> to vector<8x128xf32>
      %119 = vector.extract_strided_slice %117 {offsets = [0, 128], sizes = [8, 128], strides = [1, 1]} : vector<8x384xf32> to vector<8x128xf32>
      %120 = vector.extract_strided_slice %117 {offsets = [0, 256], sizes = [8, 128], strides = [1, 1]} : vector<8x384xf32> to vector<8x128xf32>
      %121 = vector.extract_strided_slice %111 {offsets = [0, 384], sizes = [8, 128], strides = [1, 1]} : vector<8x512xf32> to vector<8x128xf32>
      %122 = math.tanh %121 : vector<8x128xf32>
      %123 = arith.mulf %119, %99 : vector<8x128xf32>
      %124 = arith.mulf %118, %122 : vector<8x128xf32>
      %125 = arith.addf %123, %124 : vector<8x128xf32>
      %126 = math.tanh %125 : vector<8x128xf32>
      %127 = arith.mulf %120, %126 : vector<8x128xf32>
      %128 = arith.index_cast %105 : i32 to index
      %c0_45 = arith.constant 0 : index
      %129 = vector.load %arg7[%128, %c0_45] : memref<64x128xf32, #tpu.memory_space<vmem>>, vector<8x128xf32>
      tpu.vector_store %arg7[%128, %c0_45], %127 {strides = array<i32>} : memref<64x128xf32, #tpu.memory_space<vmem>>, vector<8x128xf32>,
      %c4_i32 = arith.constant 4 : i32
      %c8_i32_46 = arith.constant 8 : i32
      %130 = arith.muli %c4_i32, %c8_i32_46 : i32
      %131 = tpu.assume_multiple %130, 8 : i32
      %c0_i32_47 = arith.constant 0 : i32
      %c0_i32_48 = arith.constant 0 : i32
      %132 = tpu.memref_slice %arg10[%23, %c0_i32_47, %c0_i32_48] : memref<2x64x512xf32, #tpu.memory_space<vmem>> -> memref<1x64x512xf32, #tpu.memory_space<vmem>>
      %133 = tpu.memref_squeeze %132 : memref<1x64x512xf32, #tpu.memory_space<vmem>> -> memref<64x512xf32, #tpu.memory_space<vmem>>
      %134 = arith.index_cast %131 : i32 to index
      %c0_49 = arith.constant 0 : index
      %135 = vector.load %133[%134, %c0_49] : memref<64x512xf32, #tpu.memory_space<vmem>>, vector<8x512xf32>
      %cst_50 = arith.constant dense<0.000000e+00> : vector<8x512xf32>
      %136 = tpu.matmul %127, %12, %cst_50 {dimension_numbers = #tpu.dot_dimension_numbers<[1], [0], [0], [1], [0, 0, 1, 1], [], []>} : vector<8x128xf32>, vector<128x512xf32>, vector<8x512xf32> -> vector<8x512xf32>
      %137 = arith.addf %135, %136 : vector<8x512xf32>
      %138 = vector.extract_strided_slice %137 {offsets = [0, 0], sizes = [8, 384], strides = [1, 1]} : vector<8x512xf32> to vector<8x384xf32>
      %139 = arith.negf %138 : vector<8x384xf32>
      %140 = math.exp %139 : vector<8x384xf32>
      %cst_51 = arith.constant 1.000000e+00 : f32
      %141 = vector.broadcast %cst_51 : f32 to vector<8x384xf32>
      %142 = arith.addf %141, %140 : vector<8x384xf32>
      %143 = arith.divf %141, %142 : vector<8x384xf32>
      %144 = vector.extract_strided_slice %143 {offsets = [0, 0], sizes = [8, 128], strides = [1, 1]} : vector<8x384xf32> to vector<8x128xf32>
      %145 = vector.extract_strided_slice %143 {offsets = [0, 128], sizes = [8, 128], strides = [1, 1]} : vector<8x384xf32> to vector<8x128xf32>
      %146 = vector.extract_strided_slice %143 {offsets = [0, 256], sizes = [8, 128], strides = [1, 1]} : vector<8x384xf32> to vector<8x128xf32>
      %147 = vector.extract_strided_slice %137 {offsets = [0, 384], sizes = [8, 128], strides = [1, 1]} : vector<8x512xf32> to vector<8x128xf32>
      %148 = math.tanh %147 : vector<8x128xf32>
      %149 = arith.mulf %145, %125 : vector<8x128xf32>
      %150 = arith.mulf %144, %148 : vector<8x128xf32>
      %151 = arith.addf %149, %150 : vector<8x128xf32>
      %152 = math.tanh %151 : vector<8x128xf32>
      %153 = arith.mulf %146, %152 : vector<8x128xf32>
      %154 = arith.index_cast %131 : i32 to index
      %c0_52 = arith.constant 0 : index
      %155 = vector.load %arg7[%154, %c0_52] : memref<64x128xf32, #tpu.memory_space<vmem>>, vector<8x128xf32>
      tpu.vector_store %arg7[%154, %c0_52], %153 {strides = array<i32>} : memref<64x128xf32, #tpu.memory_space<vmem>>, vector<8x128xf32>,
      %c5_i32 = arith.constant 5 : i32
      %c8_i32_53 = arith.constant 8 : i32
      %156 = arith.muli %c5_i32, %c8_i32_53 : i32
      %157 = tpu.assume_multiple %156, 8 : i32
      %c0_i32_54 = arith.constant 0 : i32
      %c0_i32_55 = arith.constant 0 : i32
      %158 = tpu.memref_slice %arg10[%23, %c0_i32_54, %c0_i32_55] : memref<2x64x512xf32, #tpu.memory_space<vmem>> -> memref<1x64x512xf32, #tpu.memory_space<vmem>>
      %159 = tpu.memref_squeeze %158 : memref<1x64x512xf32, #tpu.memory_space<vmem>> -> memref<64x512xf32, #tpu.memory_space<vmem>>
      %160 = arith.index_cast %157 : i32 to index
      %c0_56 = arith.constant 0 : index
      %161 = vector.load %159[%160, %c0_56] : memref<64x512xf32, #tpu.memory_space<vmem>>, vector<8x512xf32>
      %cst_57 = arith.constant dense<0.000000e+00> : vector<8x512xf32>
      %162 = tpu.matmul %153, %12, %cst_57 {dimension_numbers = #tpu.dot_dimension_numbers<[1], [0], [0], [1], [0, 0, 1, 1], [], []>} : vector<8x128xf32>, vector<128x512xf32>, vector<8x512xf32> -> vector<8x512xf32>
      %163 = arith.addf %161, %162 : vector<8x512xf32>
      %164 = vector.extract_strided_slice %163 {offsets = [0, 0], sizes = [8, 384], strides = [1, 1]} : vector<8x512xf32> to vector<8x384xf32>
      %165 = arith.negf %164 : vector<8x384xf32>
      %166 = math.exp %165 : vector<8x384xf32>
      %cst_58 = arith.constant 1.000000e+00 : f32
      %167 = vector.broadcast %cst_58 : f32 to vector<8x384xf32>
      %168 = arith.addf %167, %166 : vector<8x384xf32>
      %169 = arith.divf %167, %168 : vector<8x384xf32>
      %170 = vector.extract_strided_slice %169 {offsets = [0, 0], sizes = [8, 128], strides = [1, 1]} : vector<8x384xf32> to vector<8x128xf32>
      %171 = vector.extract_strided_slice %169 {offsets = [0, 128], sizes = [8, 128], strides = [1, 1]} : vector<8x384xf32> to vector<8x128xf32>
      %172 = vector.extract_strided_slice %169 {offsets = [0, 256], sizes = [8, 128], strides = [1, 1]} : vector<8x384xf32> to vector<8x128xf32>
      %173 = vector.extract_strided_slice %163 {offsets = [0, 384], sizes = [8, 128], strides = [1, 1]} : vector<8x512xf32> to vector<8x128xf32>
      %174 = math.tanh %173 : vector<8x128xf32>
      %175 = arith.mulf %171, %151 : vector<8x128xf32>
      %176 = arith.mulf %170, %174 : vector<8x128xf32>
      %177 = arith.addf %175, %176 : vector<8x128xf32>
      %178 = math.tanh %177 : vector<8x128xf32>
      %179 = arith.mulf %172, %178 : vector<8x128xf32>
      %180 = arith.index_cast %157 : i32 to index
      %c0_59 = arith.constant 0 : index
      %181 = vector.load %arg7[%180, %c0_59] : memref<64x128xf32, #tpu.memory_space<vmem>>, vector<8x128xf32>
      tpu.vector_store %arg7[%180, %c0_59], %179 {strides = array<i32>} : memref<64x128xf32, #tpu.memory_space<vmem>>, vector<8x128xf32>,
      %c6_i32 = arith.constant 6 : i32
      %c8_i32_60 = arith.constant 8 : i32
      %182 = arith.muli %c6_i32, %c8_i32_60 : i32
      %183 = tpu.assume_multiple %182, 8 : i32
      %c0_i32_61 = arith.constant 0 : i32
      %c0_i32_62 = arith.constant 0 : i32
      %184 = tpu.memref_slice %arg10[%23, %c0_i32_61, %c0_i32_62] : memref<2x64x512xf32, #tpu.memory_space<vmem>> -> memref<1x64x512xf32, #tpu.memory_space<vmem>>
      %185 = tpu.memref_squeeze %184 : memref<1x64x512xf32, #tpu.memory_space<vmem>> -> memref<64x512xf32, #tpu.memory_space<vmem>>
      %186 = arith.index_cast %183 : i32 to index
      %c0_63 = arith.constant 0 : index
      %187 = vector.load %185[%186, %c0_63] : memref<64x512xf32, #tpu.memory_space<vmem>>, vector<8x512xf32>
      %cst_64 = arith.constant dense<0.000000e+00> : vector<8x512xf32>
      %188 = tpu.matmul %179, %12, %cst_64 {dimension_numbers = #tpu.dot_dimension_numbers<[1], [0], [0], [1], [0, 0, 1, 1], [], []>} : vector<8x128xf32>, vector<128x512xf32>, vector<8x512xf32> -> vector<8x512xf32>
      %189 = arith.addf %187, %188 : vector<8x512xf32>
      %190 = vector.extract_strided_slice %189 {offsets = [0, 0], sizes = [8, 384], strides = [1, 1]} : vector<8x512xf32> to vector<8x384xf32>
      %191 = arith.negf %190 : vector<8x384xf32>
      %192 = math.exp %191 : vector<8x384xf32>
      %cst_65 = arith.constant 1.000000e+00 : f32
      %193 = vector.broadcast %cst_65 : f32 to vector<8x384xf32>
      %194 = arith.addf %193, %192 : vector<8x384xf32>
      %195 = arith.divf %193, %194 : vector<8x384xf32>
      %196 = vector.extract_strided_slice %195 {offsets = [0, 0], sizes = [8, 128], strides = [1, 1]} : vector<8x384xf32> to vector<8x128xf32>
      %197 = vector.extract_strided_slice %195 {offsets = [0, 128], sizes = [8, 128], strides = [1, 1]} : vector<8x384xf32> to vector<8x128xf32>
      %198 = vector.extract_strided_slice %195 {offsets = [0, 256], sizes = [8, 128], strides = [1, 1]} : vector<8x384xf32> to vector<8x128xf32>
      %199 = vector.extract_strided_slice %189 {offsets = [0, 384], sizes = [8, 128], strides = [1, 1]} : vector<8x512xf32> to vector<8x128xf32>
      %200 = math.tanh %199 : vector<8x128xf32>
      %201 = arith.mulf %197, %177 : vector<8x128xf32>
      %202 = arith.mulf %196, %200 : vector<8x128xf32>
      %203 = arith.addf %201, %202 : vector<8x128xf32>
      %204 = math.tanh %203 : vector<8x128xf32>
      %205 = arith.mulf %198, %204 : vector<8x128xf32>
      %206 = arith.index_cast %183 : i32 to index
      %c0_66 = arith.constant 0 : index
      %207 = vector.load %arg7[%206, %c0_66] : memref<64x128xf32, #tpu.memory_space<vmem>>, vector<8x128xf32>
      tpu.vector_store %arg7[%206, %c0_66], %205 {strides = array<i32>} : memref<64x128xf32, #tpu.memory_space<vmem>>, vector<8x128xf32>,
      %c7_i32 = arith.constant 7 : i32
      %c8_i32_67 = arith.constant 8 : i32
      %208 = arith.muli %c7_i32, %c8_i32_67 : i32
      %209 = tpu.assume_multiple %208, 8 : i32
      %c0_i32_68 = arith.constant 0 : i32
      %c0_i32_69 = arith.constant 0 : i32
      %210 = tpu.memref_slice %arg10[%23, %c0_i32_68, %c0_i32_69] : memref<2x64x512xf32, #tpu.memory_space<vmem>> -> memref<1x64x512xf32, #tpu.memory_space<vmem>>
      %211 = tpu.memref_squeeze %210 : memref<1x64x512xf32, #tpu.memory_space<vmem>> -> memref<64x512xf32, #tpu.memory_space<vmem>>
      %212 = arith.index_cast %209 : i32 to index
      %c0_70 = arith.constant 0 : index
      %213 = vector.load %211[%212, %c0_70] : memref<64x512xf32, #tpu.memory_space<vmem>>, vector<8x512xf32>
      %cst_71 = arith.constant dense<0.000000e+00> : vector<8x512xf32>
      %214 = tpu.matmul %205, %12, %cst_71 {dimension_numbers = #tpu.dot_dimension_numbers<[1], [0], [0], [1], [0, 0, 1, 1], [], []>} : vector<8x128xf32>, vector<128x512xf32>, vector<8x512xf32> -> vector<8x512xf32>
      %215 = arith.addf %213, %214 : vector<8x512xf32>
      %216 = vector.extract_strided_slice %215 {offsets = [0, 0], sizes = [8, 384], strides = [1, 1]} : vector<8x512xf32> to vector<8x384xf32>
      %217 = arith.negf %216 : vector<8x384xf32>
      %218 = math.exp %217 : vector<8x384xf32>
      %cst_72 = arith.constant 1.000000e+00 : f32
      %219 = vector.broadcast %cst_72 : f32 to vector<8x384xf32>
      %220 = arith.addf %219, %218 : vector<8x384xf32>
      %221 = arith.divf %219, %220 : vector<8x384xf32>
      %222 = vector.extract_strided_slice %221 {offsets = [0, 0], sizes = [8, 128], strides = [1, 1]} : vector<8x384xf32> to vector<8x128xf32>
      %223 = vector.extract_strided_slice %221 {offsets = [0, 128], sizes = [8, 128], strides = [1, 1]} : vector<8x384xf32> to vector<8x128xf32>
      %224 = vector.extract_strided_slice %221 {offsets = [0, 256], sizes = [8, 128], strides = [1, 1]} : vector<8x384xf32> to vector<8x128xf32>
      %225 = vector.extract_strided_slice %215 {offsets = [0, 384], sizes = [8, 128], strides = [1, 1]} : vector<8x512xf32> to vector<8x128xf32>
      %226 = math.tanh %225 : vector<8x128xf32>
      %227 = arith.mulf %223, %203 : vector<8x128xf32>
      %228 = arith.mulf %222, %226 : vector<8x128xf32>
      %229 = arith.addf %227, %228 : vector<8x128xf32>
      %230 = math.tanh %229 : vector<8x128xf32>
      %231 = arith.mulf %224, %230 : vector<8x128xf32>
      %232 = arith.index_cast %209 : i32 to index
      %c0_73 = arith.constant 0 : index
      %233 = vector.load %arg7[%232, %c0_73] : memref<64x128xf32, #tpu.memory_space<vmem>>, vector<8x128xf32>
      tpu.vector_store %arg7[%232, %c0_73], %231 {strides = array<i32>} : memref<64x128xf32, #tpu.memory_space<vmem>>, vector<8x128xf32>,
      %c8_i32_74 = arith.constant 8 : i32
      %c0_75 = arith.constant 0 : index
      %c0_76 = arith.constant 0 : index
      %234 = vector.load %arg11[%c0_75, %c0_76] : memref<8x128xf32, #tpu.memory_space<vmem>>, vector<8x128xf32>
      tpu.vector_store %arg11[%c0_75, %c0_76], %231 {strides = array<i32>} : memref<8x128xf32, #tpu.memory_space<vmem>>, vector<8x128xf32>,
      %c0_77 = arith.constant 0 : index
      %c0_78 = arith.constant 0 : index
      %235 = vector.load %arg12[%c0_77, %c0_78] : memref<8x128xf32, #tpu.memory_space<vmem>>, vector<8x128xf32>
      tpu.vector_store %arg12[%c0_77, %c0_78], %229 {strides = array<i32>} : memref<8x128xf32, #tpu.memory_space<vmem>>, vector<8x128xf32>,
    } else {
    }
    %c1_i32_4 = arith.constant 1 : i32
    %9 = arith.cmpi eq, %arg0, %c1_i32_4 : i32
    %10 = arith.extui %9 : i1 to i32
    %c0_i32_5 = arith.constant 0 : i32
    %11 = arith.cmpi ne, %10, %c0_i32_5 : i32
    scf.if %11 {
      %c0 = arith.constant 0 : index
      %c0_6 = arith.constant 0 : index
      %12 = vector.load %arg11[%c0, %c0_6] : memref<8x128xf32, #tpu.memory_space<vmem>>, vector<8x128xf32>
      %c0_7 = arith.constant 0 : index
      %c0_8 = arith.constant 0 : index
      %13 = vector.load %arg8[%c0_7, %c0_8] : memref<8x128xf32, #tpu.memory_space<vmem>>, vector<8x128xf32>
      tpu.vector_store %arg8[%c0_7, %c0_8], %12 {strides = array<i32>} : memref<8x128xf32, #tpu.memory_space<vmem>>, vector<8x128xf32>,
      %c0_9 = arith.constant 0 : index
      %c0_10 = arith.constant 0 : index
      %14 = vector.load %arg12[%c0_9, %c0_10] : memref<8x128xf32, #tpu.memory_space<vmem>>, vector<8x128xf32>
      %c0_11 = arith.constant 0 : index
      %c0_12 = arith.constant 0 : index
      %15 = vector.load %arg9[%c0_11, %c0_12] : memref<8x128xf32, #tpu.memory_space<vmem>>, vector<8x128xf32>
      tpu.vector_store %arg9[%c0_11, %c0_12], %14 {strides = array<i32>} : memref<8x128xf32, #tpu.memory_space<vmem>>, vector<8x128xf32>,
    } else {
    }
    return
  }
  func.func @transform_0(%arg0: i32) -> (i32, i32) {
    %c0_i32 = arith.constant 0 : i32
    %0 = arith.minsi %arg0, %c0_i32 : i32
    %c0_i32_0 = arith.constant 0 : i32
    %c0_i32_1 = arith.constant 0 : i32
    return %0, %c0_i32_0 : i32, i32
  }
  func.func @transform_1(%arg0: i32) -> (i32, i32) {
    %c0_i32 = arith.constant 0 : i32
    %c0_i32_0 = arith.constant 0 : i32
    %c0_i32_1 = arith.constant 0 : i32
    return %c0_i32, %c0_i32_0 : i32, i32
  }
  func.func @transform_2(%arg0: i32) -> (i32, i32) {
    %c0_i32 = arith.constant 0 : i32
    %c0_i32_0 = arith.constant 0 : i32
    %c0_i32_1 = arith.constant 0 : i32
    return %c0_i32, %c0_i32_0 : i32, i32
  }
  func.func @transform_3(%arg0: i32) -> (i32, i32) {
    %c0_i32 = arith.constant 0 : i32
    %c0_i32_0 = arith.constant 0 : i32
    %c0_i32_1 = arith.constant 0 : i32
    return %c0_i32, %c0_i32_0 : i32, i32
  }
  func.func @transform_4(%arg0: i32) -> (i32, i32) {
    %c0_i32 = arith.constant 0 : i32
    %c0_i32_0 = arith.constant 0 : i32
    %c0_i32_1 = arith.constant 0 : i32
    return %c0_i32, %c0_i32_0 : i32, i32
  }
  func.func @transform_5(%arg0: i32) -> (i32, i32) {
    %c0_i32 = arith.constant 0 : i32
    %c0_i32_0 = arith.constant 0 : i32
    %c0_i32_1 = arith.constant 0 : i32
    return %c0_i32, %c0_i32_0 : i32, i32
  }
  func.func @transform_6(%arg0: i32) -> (i32, i32) {
    %c1_i32 = arith.constant 1 : i32
    %0 = arith.subi %arg0, %c1_i32 : i32
    %c0_i32 = arith.constant 0 : i32
    %1 = arith.maxsi %0, %c0_i32 : i32
    %c0_i32_0 = arith.constant 0 : i32
    %c0_i32_1 = arith.constant 0 : i32
    return %1, %c0_i32_0 : i32, i32
  }
  func.func @transform_7(%arg0: i32) -> (i32, i32) {
    %c0_i32 = arith.constant 0 : i32
    %c0_i32_0 = arith.constant 0 : i32
    %c0_i32_1 = arith.constant 0 : i32
    return %c0_i32, %c0_i32_0 : i32, i32
  }
  func.func @transform_8(%arg0: i32) -> (i32, i32) {
    %c0_i32 = arith.constant 0 : i32
    %c0_i32_0 = arith.constant 0 : i32
    %c0_i32_1 = arith.constant 0 : i32
    return %c0_i32, %c0_i32_0 : i32, i32
  }
}

</mosaic_0001>

<bundles_post_ra>
// kernel: tpu_custom_call.1
= control target key start
LH: loop header
LB: loop body
LE: loop exit
PB: predicated region body
PF: predicated region fallthrough
CT: control target
= control target key end

     0   :  { %14 = vsyncpa [#allocation6], 0  ;;  %s4059_s0 = inlined_call_operand.vmem [shape: bf16[64,4], index: 0, kind: input, shape index: {}]   ;;  %s4060_s1 = inlined_call_operand.vmem [shape: bf16[4,512], index: 1, kind: input, shape index: {}]   ;;  %s4061_s2 = inlined_call_operand.hbm [shape: f32[128,512], index: 2, kind: input, shape index: {}]   ;;  %s4062_s3 = inlined_call_operand.vmem [shape: f32[1,512], index: 3, kind: input, shape index: {}]   ;;  %s4063_s4 = inlined_call_operand.vmem [shape: f32[8,128], index: 4, kind: input, shape index: {}]   ;;  %s4064_s5 = inlined_call_operand.vmem [shape: f32[8,128], index: 5, kind: input, shape index: {}]   ;;  %s4065_s6 = inlined_call_operand.hbm [shape: f32[64,128], index: 6, kind: output, shape index: {0}]   ;;  %s4066_s7 = inlined_call_operand.hbm [shape: f32[8,128], index: 7, kind: output, shape index: {1}]   ;;  %s4067_s8 = inlined_call_operand.hbm [shape: f32[8,128], index: 8, kind: output, shape index: {2}]  }
   0x1   :  { %15 = vsyncpa [#allocation7], 0 }
   0x2   :  { %17 = vsyncpa [#allocation7 + $0x1], 0 }
   0x3   :  { %18 = vsyncpa [#allocation10], 0  ;;  %s3350_s27 = smov 0   ;;  %s3352_s28 = smov 0  }
   0x4   :  { %s3354_s29 = smov 0   ;;  %s3356_s30 = smov 0  }
   0x5 LB: > { %s3371_s9 = sadd.s32 4294967295, %s3292_s30   ;;  %s2314_s10 = sadd.s32 4294967294, %s3292_s30   ;;  %s3292_s30 = sphi %s3356_s30, %s4096_s30   ;;  %s3288_s29 = sphi %s3354_s29, %s4095_s29   ;;  %s3284_s28 = sphi %s3352_s28, %s4094_s28   ;;  %s3280_s27 = sphi %s3350_s27, %s4093_s27  }
   0x6   : > { %s3375_s11 = sadd.s32 1, %s3292_s30   ;;  %p164_p0 = scmp.gt.s32.totalorder %s3371_s9, 0 }
   0x7   : > { %s2316_s12 = sadd.s32 4294967295, %s3375_s11  ;;  %s172_s13 = sadd.s32 1, %s3288_s29 }
   0x8   : > { %s165_s14 = scalar_select %p164_p0, %s3371_s9, 0 }
   0x9   : > { %p167_p1 = scmp.gt.s32.totalorder %s2316_s12, 0  ;;  %p182_p2 = scmp.ne.s32.totalorder %s3288_s29, %s3284_s28 }
   0xa   : > { %p4068_p3 = scmp.eq.s32.totalorder %s3371_s9, 1  ;;  %p188_p4 = scmp.ne.s32.totalorder %s3284_s28, %s3280_s27 }
   0xb   : > { %s4098_s12 = smov (!%p167_p1, %s2316_s12), 0  ;;  %p189_p6 = scmp.eq.s32.totalorder %s2314_s10, 1 }
   0xc   : > { %p3388_p5 = por %p4068_p3, %p182_p2  ;;  %s169_s16 = ssub.s32 %s165_s14, %s4098_s12 }
   0xd   : > { %p2317_p7 = scmp.ge.s32.totalorder %s3292_s30, 1  ;;  %p170_p8 = scmp.eq.s32.totalorder %s169_s16, 0 }
   0xe   : > { %s4073_s15 = scalar_select %p3388_p5, 1, 0 }
   0xf   : > { %p3393_p9 = por %p189_p6, %p188_p4  ;;  %p238_p10 = scmp.lt.s32.totalorder %s3292_s30, 3 }
  0x10   : > { %s3400_s18 = scalar_select %p170_p8, %s3288_s29, %s172_s13  }
  0x11   : > { %s4074_s17 = scalar_select %p3393_p9, 1, 0 }
  0x12   : > { %p3402_p12 = pnand %p2317_p7, %p238_p10  ;;  %p4069_p13 = scmp.eq.s32.totalorder %s3371_s9, 0 }
  0x13   : > { %s3294_s20 = smov [#allocation5]   ;;  %s3142_s25 = scalar_lea.hbm %s4061_s2, 8192 }
  0x14   : > { %s4075_s19 = scalar_select %p3402_p12, 1, 0 }
  0x15   : > { %p2952_p0 = pneg %p3402_p12  ;;  %s253_s21 = sshll.u32 %s3294_s20, 4  ;;  %s254_s21 = int_to_ptr.vmem [resolvable:$true] %s253_s21 }
  0x16   : > { %p3143_p2 = scmp.ne.s32.totalorder %s4061_s2, %s3142_s25  ;;  %p3149_p8 = scmp.lt.u32.totalorder %s3142_s25, %s4061_s2 }
  0x17   : > { %p3411_p1 = pnand %p4069_p13, %p2952_p0 }
  0x19   : > { %p3144_p4 = pneg %p3411_p1 }
  0x1b   : > { %p3145_p6 = pnand %p3144_p4, %p3143_p2 }
  0x1d   : > { %p3146_p7 = pneg %p3145_p6 }
  0x1f   : > { %p3151_p10 = pnand %p3149_p8, %p3146_p7 }
  0x21   : > { %3154 = shalt.err (!%p3151_p10)
}
  0x22   : > { %s3155_s14 = scalar_lea.vmem %s254_s21, 8192  ;;  %p3163_p13 = scmp.lt.s32.totalorder %s254_s21, %s254_s21 }
  0x23   : > { %p3156_p0 = scmp.ne.s32.totalorder %s254_s21, %s3155_s14  ;;  %p3164_p9 = scmp.lt.s32.totalorder %s3155_s14, %s3155_s14 }
  0x25   : > { %p3158_p3 = pnand %p3156_p0, %p3144_p4  ;;  %p3165_p5 = por %p3164_p9, %p3163_p13 }
  0x27   : > { %p3159_p11 = pneg %p3158_p3 }
  0x29   : > { %p3166_p12 = pnand %p3165_p5, %p3159_p11 }
  0x2b   : > { %3169 = shalt.err (!%p3166_p12)
}
  0x2c   : > { %s3295_s16 = smov 512   ;;  %s3296_s20 = smov 32  }
  0x2d   : > { %2955 = dma.hbm_to_vmem [thread:$0]  (!%p3411_p1), %s4061_s2, 8192, %s254_s21, [#allocation6], %s3295_s16, %s3295_s16, %s3296_s20  }
  0x2e   : > { %p4077_p2 = scmp.ne.s32.totalorder %s4075_s19, 0 }
  0x2f   : > { %p4078_p6 = scmp.eq.s32.totalorder (!%p4077_p2), %s3371_s9, 0 }
  0x30   : > { %291 = sbr.rel (%p4077_p2) target bundleno = 2514 (0x9d2), region = 44 }
  0x37   : > { %3267 = dma.done.wait (%p4078_p6), [#allocation6], 8192   ;;  %p4079_p3 = pmov %p4078_p6 }
  0x38   : > { %s4072_s25 = sand.u32 1, %s3284_s28   ;;  %p327_p5 = scmp.lt.s32.totalorder %s3371_s9, 0 }
  0x39   : > { %3269 = vsyncadd (%p4079_p3), [#allocation6], 4294959104  ;;  %s2322_s22 = sshll.u32 %s4072_s25, 6  ;;  %p4080_p11 = scmp.ne.s32.totalorder %s3371_s9, 0 }
  0x3a   : > { %s328_s21 = scalar_select %p327_p5, %s3371_s9, 0 }
  0x3b   : > { %s3449_s14 = scalar_lea.vmem [#allocation8], %s2322_s22  ;;  %345 = sbr.rel (%p4080_p11) target bundleno = 66 (0x42), region = 52  ;;  %v346_v0 = vld [vmem:[%s4063_s4] sm:$0xff] (!%p4080_p11) }
  0x3c   : > { %s2323_s26 = sshll.u32 %s328_s21, 3  ;;  %v348_v1 = vld [vmem:[%s4064_s5] sm:$0xff] (!%p4080_p11)  ;;  %347 = vst [vmem:[#allocation3] sm:$0xff] (!%p4080_p11), %v346_v0 }
  0x3d   : > { %p330_p9 = scmp.lt.s32.totalorder %s2323_s26, 7  ;;  %349 = vst [vmem:[#allocation4] sm:$0xff] (!%p4080_p11), %v348_v1 }
  0x3f   : > { %s4100_s26 = smov (!%p330_p9, %s2323_s26), 7 }
  0x40   : > { %s2324_s19 = sshll.u32 %s4100_s26, 2 }
  0x41   : > { %s3447_s13 = scalar_lea.vmem %s4059_s0, %s2324_s19 }
  0x42 PF: > { %p2326_p12 = scmp.ge.s32.totalorder %s3371_s9, 1 }
  0x43   : > { %v362_v2 = vld [vmem:[%s4060_s1] sm:$0xff] (!%p2326_p12)  ;;  %v365_v3 = vlaneseq (!%p2326_p12)  ;;  %v3297_v4 = vmov (!%p2326_p12), 1983009808   ;;  %v3298_v6 = vmov (!%p2326_p12), 0   ;;  %vm436_vm0 = vcmask (!%p2326_p12), 1041408   ;;  %v3011_v18 = vld [vmem:[%s3447_s13 + $0x8] sm:$0xff] (!%p2326_p12)  }
  0x44   : > { %353 = sbr.rel (%p2326_p12) target bundleno = 324 (0x144), region = 56  ;;  %v408_v5 = vunpack.c.l.s4 (!%p2326_p12), %v3297_v4  ;;  %481 = vmatprep.mubr.bf16.mxu0 (!%p2326_p12), %v3298_v6  ;;  %554 = vmatprep.mubr.bf16.mxu1 (!%p2326_p12), %v3298_v6  ;;  %v406_v9 = vcombine.high (!%p2326_p12), %v362_v2, %v362_v2  ;;  %v3010_v17 = vld [vmem:[%s3447_s13] sm:$0xff] (!%p2326_p12)   ;;  %vm423_vm1 = vcmask (!%p2326_p12), 31744   ;;  %v3012_v19 = vld [vmem:[%s3447_s13 + $0x10] sm:$0xff] (!%p2326_p12)   ;;  %v3013_v20 = vld [vmem:[%s3447_s13 + $0x18] sm:$0xff] (!%p2326_p12)   ;;  %s596_s26 = ssub.s32 (!%p2326_p12), 0, %s3371_s9 }
  0x45   : > { %v366_v7 = vshrl.u32 (!%p2326_p12), %v365_v3, 7  ;;  %s2341_s19 = smin.u32 (!%p2326_p12), %s3371_s9, %s596_s26  ;;  %v363_v23 = vld [vmem:[%s4062_s3] sm:$0xf] (!%p2326_p12) }
  0x46   : > { %v409_v8 = vunpack.c.0.s8 (!%p2326_p12), %v408_v5  ;;  %s598_s10 = sand.u32 (!%p2326_p12), 1, %s2341_s19  }
  0x47   : > { %s599_s12 = ssub.s32 (!%p2326_p12), 0, %s598_s10  ;;  %v367_v21 = vsub.s32 (!%p2326_p12), 0, %v366_v7  ;;  %v375_v22 = vsub.s32 (!%p2326_p12), 2, %v366_v7  ;;  %v371_v24 = vsub.s32 (!%p2326_p12), 1, %v366_v7  ;;  %v379_v25 = vsub.s32 (!%p2326_p12), 3, %v366_v7 }
  0x48   : > { %v412_v10 = vsub.s32 (!%p2326_p12), %v409_v8, %v366_v7 }
  0x49   : > { %v3482_v26 = vrot.slane (!%p2326_p12), %v363_v23, %v367_v21  ;;  %v3484_v27 = vrot.slane (!%p2326_p12), %v363_v23, %v375_v22  ;;  %v3486_v28 = vrot.slane (!%p2326_p12), %v363_v23, %v371_v24  ;;  %v3488_v29 = vrot.slane (!%p2326_p12), %v363_v23, %v379_v25 }
  0x4a   : > { %v413_v11 = vrot.slane (!%p2326_p12), %v362_v2, %v412_v10  ;;  %v420_v12 = vrot.slane (!%p2326_p12), %v406_v9, %v412_v10 }
  0x4b   : > { %s4102_s12 = smov (!%p327_p5, %s599_s12), %s598_s10 }
  0x4c   : > { %v421_v13 = vcombine.high %v413_v11, %v413_v11  ;;  %v422_v14 = vcombine.high %v420_v12, %v420_v12  ;;  %v438_v15 = vsel %vm436_vm0, %v413_v11, 0  ;;  %v444_v16 = vsel %vm436_vm0, %v420_v12, 0  ;;  %p2343_p13 = scmp.lt.s32.totalorder %s4102_s12, 0  ;;  %s605_s16 = sadd.s32 2, %s4102_s12 }
  0x4e   : > { %2331 = vmatprep.subr.msk.bf16.mxu0 %vm436_vm0, %v421_v13  ;;  %2336 = vmatprep.subr.msk.bf16.mxu1 %vm436_vm0, %v422_v14  ;;  %s4104_s16 = smov (!%p2343_p13, %s605_s16), %s4102_s12 }
  0x4f   : > { %450 = vmatpush1.bf16.msra.mxu0 %v438_v15  ;;  %523 = vmatpush1.bf16.msra.mxu1 %v444_v16  ;;  %s2423_s13 = sshll.u32 %s4104_s16, 8 }
  0x50   : > { %s3494_s24 = scalar_lea.vmem [#allocation2], %s2423_s13 }
  0x52   : > { %2332 = vmatmul.mubr.msk.bf16.vlgmr.msra.gmra.mrb[0].mxu0 %vm423_vm1, %v3010_v17  ;;  %2337 = vmatmul.mubr.msk.bf16.vlgmr.msra.gmra.mrb[0].mxu1 %vm423_vm1, %v3010_v17 }
  0x53   : > { %491 = vmatprep.mubr.bf16.mxu0 %v3298_v6  ;;  %564 = vmatprep.mubr.bf16.mxu1 %v3298_v6 }
  0x5a   : > { %2333 = vmatmul.mubr.msk.bf16.gmra.mrb[4].mxu0 %vm423_vm1, %v3011_v18  ;;  %2338 = vmatmul.mubr.msk.bf16.gmra.mrb[4].mxu1 %vm423_vm1, %v3011_v18 }
  0x5b   : > { %501 = vmatprep.mubr.bf16.mxu0 %v3298_v6  ;;  %574 = vmatprep.mubr.bf16.mxu1 %v3298_v6 }
  0x62   : > { %2334 = vmatmul.mubr.msk.bf16.gmra.mrb[8].mxu0 %vm423_vm1, %v3012_v19  ;;  %2339 = vmatmul.mubr.msk.bf16.gmra.mrb[8].mxu1 %vm423_vm1, %v3012_v19 }
  0x63   : > { %511 = vmatprep.mubr.bf16.mxu0 %v3298_v6  ;;  %584 = vmatprep.mubr.bf16.mxu1 %v3298_v6 }
  0x6a   : > { %2335 = vmatmul.mubr.msk.bf16.gmra.mrb[12].mxu0 %vm423_vm1, %v3013_v20  ;;  %2340 = vmatmul.mubr.msk.bf16.gmra.mrb[12].mxu1 %vm423_vm1, %v3013_v20 }
 0x125   : > { %v483_v30 = vpop.f32.mrb[0].mxu0  ;;  %v556_v31 = vpop.f32.mrb[0].mxu1 }
 0x126   : > { %v484_v32 = vadd.f32 %v483_v30, %v3482_v26  ;;  %v557_v33 = vadd.f32 %v556_v31, %v3484_v27  ;;  %v485_v34 = vpop.f32.mrb[1].mxu0  ;;  %v558_v35 = vpop.f32.mrb[1].mxu1 }
 0x127   : > { %v486_v36 = vadd.f32 %v485_v34, %v3486_v28  ;;  %v559_v37 = vadd.f32 %v558_v35, %v3488_v29  ;;  %v487_v38 = vpop.f32.mrb[2].mxu0  ;;  %v560_v39 = vpop.f32.mrb[2].mxu1 }
 0x128   : > { %610 = vst [vmem:[%s3494_s24] sm:$0xff] %v484_v32  ;;  %612 = vst [vmem:[%s3494_s24 + $0x10] sm:$0xff] %v557_v33  ;;  %v488_v40 = vadd.f32 %v487_v38, %v3482_v26  ;;  %v561_v41 = vadd.f32 %v560_v39, %v3484_v27  ;;  %v489_v42 = vpop.f32.mrb[3].mxu0  ;;  %v562_v43 = vpop.f32.mrb[3].mxu1 }
 0x129   : > { %611 = vst [vmem:[%s3494_s24 + $0x8] sm:$0xff] %v486_v36  ;;  %613 = vst [vmem:[%s3494_s24 + $0x18] sm:$0xff] %v559_v37  ;;  %v490_v44 = vadd.f32 %v489_v42, %v3486_v28  ;;  %v563_v45 = vadd.f32 %v562_v43, %v3488_v29 }
 0x12a   : > { %614 = vst [vmem:[%s3494_s24 + $0x20] sm:$0xff] %v488_v40  ;;  %616 = vst [vmem:[%s3494_s24 + $0x30] sm:$0xff] %v561_v41 }
 0x12b   : > { %615 = vst [vmem:[%s3494_s24 + $0x28] sm:$0xff] %v490_v44  ;;  %617 = vst [vmem:[%s3494_s24 + $0x38] sm:$0xff] %v563_v45 }
 0x12d   : > { %v493_v46 = vpop.f32.mrb[4].mxu0  ;;  %v566_v47 = vpop.f32.mrb[4].mxu1 }
 0x12e   : > { %v494_v48 = vadd.f32 %v493_v46, %v3482_v26  ;;  %v567_v49 = vadd.f32 %v566_v47, %v3484_v27  ;;  %v495_v50 = vpop.f32.mrb[5].mxu0  ;;  %v568_v51 = vpop.f32.mrb[5].mxu1 }
 0x12f   : > { %v496_v52 = vadd.f32 %v495_v50, %v3486_v28  ;;  %v569_v53 = vadd.f32 %v568_v51, %v3488_v29  ;;  %v497_v54 = vpop.f32.mrb[6].mxu0  ;;  %v570_v55 = vpop.f32.mrb[6].mxu1 }
 0x130   : > { %618 = vst [vmem:[%s3494_s24 + $0x40] sm:$0xff] %v494_v48  ;;  %620 = vst [vmem:[%s3494_s24 + $0x50] sm:$0xff] %v567_v49  ;;  %v498_v56 = vadd.f32 %v497_v54, %v3482_v26  ;;  %v571_v57 = vadd.f32 %v570_v55, %v3484_v27  ;;  %v499_v58 = vpop.f32.mrb[7].mxu0  ;;  %v572_v59 = vpop.f32.mrb[7].mxu1 }
 0x131   : > { %619 = vst [vmem:[%s3494_s24 + $0x48] sm:$0xff] %v496_v52  ;;  %621 = vst [vmem:[%s3494_s24 + $0x58] sm:$0xff] %v569_v53  ;;  %v500_v60 = vadd.f32 %v499_v58, %v3486_v28  ;;  %v573_v61 = vadd.f32 %v572_v59, %v3488_v29 }
 0x132   : > { %622 = vst [vmem:[%s3494_s24 + $0x60] sm:$0xff] %v498_v56  ;;  %624 = vst [vmem:[%s3494_s24 + $0x70] sm:$0xff] %v571_v57 }
 0x133   : > { %623 = vst [vmem:[%s3494_s24 + $0x68] sm:$0xff] %v500_v60  ;;  %625 = vst [vmem:[%s3494_s24 + $0x78] sm:$0xff] %v573_v61 }
 0x135   : > { %v503_v62 = vpop.f32.mrb[8].mxu0  ;;  %v576_v63 = vpop.f32.mrb[8].mxu1 }
 0x136   : > { %v504_v0 = vadd.f32 %v503_v62, %v3482_v26  ;;  %v577_v1 = vadd.f32 %v576_v63, %v3484_v27  ;;  %v505_v2 = vpop.f32.mrb[9].mxu0  ;;  %v578_v3 = vpop.f32.mrb[9].mxu1 }
 0x137   : > { %v506_v4 = vadd.f32 %v505_v2, %v3486_v28  ;;  %v579_v5 = vadd.f32 %v578_v3, %v3488_v29  ;;  %v507_v6 = vpop.f32.mrb[10].mxu0  ;;  %v580_v7 = vpop.f32.mrb[10].mxu1 }
 0x138   : > { %626 = vst [vmem:[%s3494_s24 + $0x80] sm:$0xff] %v504_v0  ;;  %628 = vst [vmem:[%s3494_s24 + $0x90] sm:$0xff] %v577_v1  ;;  %v508_v8 = vadd.f32 %v507_v6, %v3482_v26  ;;  %v581_v9 = vadd.f32 %v580_v7, %v3484_v27  ;;  %v509_v10 = vpop.f32.mrb[11].mxu0  ;;  %v582_v11 = vpop.f32.mrb[11].mxu1 }
 0x139   : > { %627 = vst [vmem:[%s3494_s24 + $0x88] sm:$0xff] %v506_v4  ;;  %629 = vst [vmem:[%s3494_s24 + $0x98] sm:$0xff] %v579_v5  ;;  %v510_v12 = vadd.f32 %v509_v10, %v3486_v28  ;;  %v583_v13 = vadd.f32 %v582_v11, %v3488_v29 }
 0x13a   : > { %630 = vst [vmem:[%s3494_s24 + $0xa0] sm:$0xff] %v508_v8  ;;  %632 = vst [vmem:[%s3494_s24 + $0xb0] sm:$0xff] %v581_v9 }
 0x13b   : > { %631 = vst [vmem:[%s3494_s24 + $0xa8] sm:$0xff] %v510_v12  ;;  %633 = vst [vmem:[%s3494_s24 + $0xb8] sm:$0xff] %v583_v13 }
 0x13d   : > { %v513_v14 = vpop.f32.mrb[12].mxu0  ;;  %v586_v15 = vpop.f32.mrb[12].mxu1 }
 0x13e   : > { %v514_v16 = vadd.f32 %v513_v14, %v3482_v26  ;;  %v587_v17 = vadd.f32 %v586_v15, %v3484_v27  ;;  %v515_v18 = vpop.f32.mrb[13].mxu0  ;;  %v588_v19 = vpop.f32.mrb[13].mxu1 }
 0x13f   : > { %v516_v20 = vadd.f32 %v515_v18, %v3486_v28  ;;  %v589_v21 = vadd.f32 %v588_v19, %v3488_v29  ;;  %v517_v22 = vpop.f32.mrb[14].mxu0  ;;  %v590_v23 = vpop.f32.mrb[14].mxu1 }
 0x140   : > { %634 = vst [vmem:[%s3494_s24 + $0xc0] sm:$0xff] %v514_v16  ;;  %636 = vst [vmem:[%s3494_s24 + $0xd0] sm:$0xff] %v587_v17  ;;  %v518_v24 = vadd.f32 %v517_v22, %v3482_v26  ;;  %v591_v25 = vadd.f32 %v590_v23, %v3484_v27  ;;  %v519_v30 = vpop.f32.mrb[15].mxu0  ;;  %v592_v31 = vpop.f32.mrb[15].mxu1 }
 0x141   : > { %635 = vst [vmem:[%s3494_s24 + $0xc8] sm:$0xff] %v516_v20  ;;  %637 = vst [vmem:[%s3494_s24 + $0xd8] sm:$0xff] %v589_v21  ;;  %v520_v32 = vadd.f32 %v519_v30, %v3486_v28  ;;  %v593_v33 = vadd.f32 %v592_v31, %v3488_v29 }
 0x142   : > { %638 = vst [vmem:[%s3494_s24 + $0xe0] sm:$0xff] %v518_v24  ;;  %640 = vst [vmem:[%s3494_s24 + $0xf0] sm:$0xff] %v591_v25 }
 0x143   : > { %639 = vst [vmem:[%s3494_s24 + $0xe8] sm:$0xff] %v520_v32  ;;  %641 = vst [vmem:[%s3494_s24 + $0xf8] sm:$0xff] %v593_v33 }
 0x144 PF: > { %p2346_p1 = scmp.lt.s32.totalorder %s3371_s9, 1 }
 0x145   : > { %v647_v34 = vld [vmem:[#allocation5 + $0x8] sm:$0xff] (!%p2346_p1)  ;;  %v646_v35 = vld [vmem:[#allocation5] sm:$0xff] (!%p2346_p1)  ;;  %v3299_v39 = vmov (!%p2346_p1), 0.0   ;;  %v649_v49 = vld [vmem:[#allocation5 + $0x18] sm:$0xff] (!%p2346_p1)  ;;  %s2347_s21 = sadd.s32 (!%p2346_p1), 4294967295, %s3371_s9 }
 0x146   : > { %645 = sbr.rel (%p2346_p1) target bundleno = 2426 (0x97a), region = 60  ;;  %v651_v26 = vld [vmem:[#allocation5 + $0x28] sm:$0xff] (!%p2346_p1)  ;;  %v650_v36 = vld [vmem:[#allocation5 + $0x20] sm:$0xff] (!%p2346_p1)  ;;  %799 = vmatprep.mubr.f32.mxu0 (!%p2346_p1), %v3299_v39  ;;  %870 = vmatprep.mubr.f32.mxu1 (!%p2346_p1), %v3299_v39  ;;  %v653_v50 = vld [vmem:[#allocation5 + $0x38] sm:$0xff] (!%p2346_p1)  ;;  %s712_s22 = ssub.s32 (!%p2346_p1), 0, %s2347_s21 }
 0x147   : > { %v3557_v27 = vpack.c.bf16 (!%p2346_p1), %v651_v26, %v647_v34  ;;  %v655_v37 = vld [vmem:[#allocation5 + $0x48] sm:$0xff] (!%p2346_p1)  ;;  %v3561_v28 = vpack.c.bf16 (!%p2346_p1), %v650_v36, %v646_v35  ;;  %v654_v40 = vld [vmem:[#allocation5 + $0x40] sm:$0xff] (!%p2346_p1)  ;;  %v3572_v52 = vpack.c.bf16 (!%p2346_p1), %v653_v50, %v649_v49  ;;  %v648_v53 = vld [vmem:[#allocation5 + $0x10] sm:$0xff] (!%p2346_p1)  ;;  %s2348_s26 = smin.u32 (!%p2346_p1), %s2347_s21, %s712_s22  ;;  %p711_p4 = scmp.lt.s32.totalorder (!%p2346_p1), %s2347_s21, 0 }
 0x148   : > { %v659_v38 = vld [vmem:[#allocation5 + $0x68] sm:$0xff] (!%p2346_p1)  ;;  %v658_v41 = vld [vmem:[#allocation5 + $0x60] sm:$0xff] (!%p2346_p1)  ;;  %v652_v54 = vld [vmem:[#allocation5 + $0x30] sm:$0xff] (!%p2346_p1)  ;;  %s714_s19 = sand.u32 (!%p2346_p1), 1, %s2348_s26  }
 0x149   : > { %v3563_v29 = vpack.c.bf16 (!%p2346_p1), %v659_v38, %v655_v37  ;;  %v663_v42 = vld [vmem:[#allocation5 + $0x88] sm:$0xff] (!%p2346_p1)  ;;  %2427 = vmatprep.subr.bf16.mxu0 (!%p2346_p1), %v3557_v27  ;;  %v3567_v44 = vpack.c.bf16 (!%p2346_p1), %v658_v41, %v654_v40  ;;  %v662_v45 = vld [vmem:[#allocation5 + $0x80] sm:$0xff] (!%p2346_p1)  ;;  %v3574_v55 = vpack.c.bf16 (!%p2346_p1), %v652_v54, %v648_v53  ;;  %2459 = vmatprep.subr.bf16.mxu1 (!%p2346_p1), %v3572_v52  ;;  %v657_v57 = vld [vmem:[#allocation5 + $0x58] sm:$0xff] (!%p2346_p1)  ;;  %s715_s10 = ssub.s32 (!%p2346_p1), 0, %s714_s19 }
 0x14a   : > { %v667_v43 = vld [vmem:[#allocation5 + $0xa8] sm:$0xff] (!%p2346_p1)  ;;  %2429 = vmatpush1.bf16.msra.mxu0 (!%p2346_p1), %v3561_v28  ;;  %v666_v46 = vld [vmem:[#allocation5 + $0xa0] sm:$0xff] (!%p2346_p1)  ;;  %v661_v58 = vld [vmem:[#allocation5 + $0x78] sm:$0xff] (!%p2346_p1) }
 0x14b   : > { %2431 = vmatprep.subr.bf16.mxu0 (!%p2346_p1), %v3563_v29  ;;  %v3570_v47 = vpack.c.bf16 (!%p2346_p1), %v667_v43, %v663_v42  ;;  %v671_v48 = vld [vmem:[#allocation5 + $0xc8] sm:$0xff] (!%p2346_p1)  ;;  %v3577_v56 = vpack.c.bf16 (!%p2346_p1), %v666_v46, %v662_v45  ;;  %v656_v59 = vld [vmem:[#allocation5 + $0x50] sm:$0xff] (!%p2346_p1)  ;;  %v670_v61 = vld [vmem:[#allocation5 + $0xc0] sm:$0xff] (!%p2346_p1)  ;;  %2461 = vmatpush1.bf16.msra.mxu1 (!%p2346_p1), %v3574_v55  ;;  %v3584_v63 = vpack.c.bf16 (!%p2346_p1), %v661_v58, %v657_v57 }
 0x14c   : > { %v675_v51 = vld [vmem:[#allocation5 + $0xe8] sm:$0xff] (!%p2346_p1)  ;;  %v674_v62 = vld [vmem:[#allocation5 + $0xe0] sm:$0xff] (!%p2346_p1)  ;;  %v660_v0 = vld [vmem:[#allocation5 + $0x70] sm:$0xff] (!%p2346_p1) }
 0x14d   : > { %v3581_v60 = vpack.c.bf16 %v675_v51, %v671_v48  ;;  %v679_v1 = vld [vmem:[#allocation5 + $0x108] sm:$0xff]  ;;  %v3586_v3 = vpack.c.bf16 %v660_v0, %v656_v59  ;;  %v665_v4 = vld [vmem:[#allocation5 + $0x98] sm:$0xff]  ;;  %2463 = vmatprep.subr.bf16.mxu1 %v3584_v63  ;;  %v664_v6 = vld [vmem:[#allocation5 + $0x90] sm:$0xff]  ;;  %v3590_v8 = vpack.c.bf16 %v674_v62, %v670_v61  ;;  %s4106_s10 = smov (!%p711_p4, %s715_s10), %s714_s19 }
 0x14e   : > { %2433 = vmatpush1.bf16.msra.mxu0 %v3567_v44  ;;  %v683_v2 = vld [vmem:[#allocation5 + $0x128] sm:$0xff]  ;;  %v669_v5 = vld [vmem:[#allocation5 + $0xb8] sm:$0xff]  ;;  %v668_v7 = vld [vmem:[#allocation5 + $0xb0] sm:$0xff]  ;;  %p2350_p7 = scmp.lt.s32.totalorder %s4106_s10, 0  ;;  %s721_s12 = sadd.s32 2, %s4106_s10 }
 0x14f   : > { %2435 = vmatprep.subr.bf16.mxu0 %v3570_v47  ;;  %v678_v9 = vld [vmem:[#allocation5 + $0x100] sm:$0xff]  ;;  %v3592_v11 = vpack.c.bf16 %v669_v5, %v665_v4  ;;  %v3595_v12 = vpack.c.bf16 %v683_v2, %v679_v1  ;;  %2465 = vmatpush1.bf16.msra.mxu1 %v3586_v3  ;;  %v687_v13 = vld [vmem:[#allocation5 + $0x148] sm:$0xff]  ;;  %v3598_v14 = vpack.c.bf16 %v668_v7, %v664_v6  ;;  %v673_v15 = vld [vmem:[#allocation5 + $0xd8] sm:$0xff] }
 0x150   : > { %v682_v10 = vld [vmem:[#allocation5 + $0x120] sm:$0xff]  ;;  %v677_v16 = vld [vmem:[#allocation5 + $0xf8] sm:$0xff]  ;;  %v691_v17 = vld [vmem:[#allocation5 + $0x168] sm:$0xff]  ;;  %s4108_s12 = smov (!%p2350_p7, %s721_s12), %s4106_s10 }
 0x151   : > { %2467 = vmatprep.subr.bf16.mxu1 %v3592_v11  ;;  %v3601_v18 = vpack.c.bf16 %v677_v16, %v673_v15  ;;  %v672_v19 = vld [vmem:[#allocation5 + $0xd0] sm:$0xff]  ;;  %v3604_v21 = vpack.c.bf16 %v682_v10, %v678_v9  ;;  %v681_v22 = vld [vmem:[#allocation5 + $0x118] sm:$0xff]  ;;  %v3607_v24 = vpack.c.bf16 %v691_v17, %v687_v13  ;;  %v686_v25 = vld [vmem:[#allocation5 + $0x140] sm:$0xff]  ;;  %s2424_s16 = sshll.u32 %s4108_s12, 8 }
 0x152   : > { %2437 = vmatpush1.bf16.msra.mxu0 %v3577_v56  ;;  %v676_v20 = vld [vmem:[#allocation5 + $0xf0] sm:$0xff]  ;;  %v685_v23 = vld [vmem:[#allocation5 + $0x138] sm:$0xff]  ;;  %v690_v30 = vld [vmem:[#allocation5 + $0x160] sm:$0xff]  ;;  %s3692_s20 = scalar_lea.vmem [#allocation2], %s2424_s16 }
 0x153   : > { %2439 = vmatprep.subr.bf16.mxu0 %v3581_v60  ;;  %2469 = vmatpush1.bf16.msra.mxu1 %v3598_v14  ;;  %v695_v31 = vld [vmem:[#allocation5 + $0x188] sm:$0xff]  ;;  %v3610_v32 = vpack.c.bf16 %v676_v20, %v672_v19  ;;  %v3613_v34 = vpack.c.bf16 %v685_v23, %v681_v22  ;;  %v680_v26 = vld [vmem:[#allocation5 + $0x110] sm:$0xff]  ;;  %v689_v36 = vld [vmem:[#allocation5 + $0x158] sm:$0xff]  ;;  %v3616_v38 = vpack.c.bf16 %v690_v30, %v686_v25 }
 0x154   : > { %v699_v33 = vld [vmem:[#allocation5 + $0x1a8] sm:$0xff]  ;;  %2471 = vmatprep.subr.bf16.mxu1 %v3601_v18  ;;  %v684_v35 = vld [vmem:[#allocation5 + $0x130] sm:$0xff]  ;;  %v693_v37 = vld [vmem:[#allocation5 + $0x178] sm:$0xff] }
 0x155   : > { %v3619_v40 = vpack.c.bf16 %v699_v33, %v695_v31  ;;  %v694_v41 = vld [vmem:[#allocation5 + $0x180] sm:$0xff]  ;;  %v703_v43 = vld [vmem:[#allocation5 + $0x1c8] sm:$0xff]  ;;  %v3622_v45 = vpack.c.bf16 %v684_v35, %v680_v26  ;;  %v3625_v48 = vpack.c.bf16 %v693_v37, %v689_v36  ;;  %v688_v49 = vld [vmem:[#allocation5 + $0x150] sm:$0xff] }
 0x156   : > { %2441 = vmatpush1.bf16.msra.mxu0 %v3590_v8  ;;  %v698_v42 = vld [vmem:[#allocation5 + $0x1a0] sm:$0xff]  ;;  %v707_v46 = vld [vmem:[#allocation5 + $0x1e8] sm:$0xff]  ;;  %v692_v50 = vld [vmem:[#allocation5 + $0x170] sm:$0xff] }
 0x157   : > { %2443 = vmatprep.subr.bf16.mxu0 %v3595_v12  ;;  %2473 = vmatpush1.bf16.msra.mxu1 %v3610_v32  ;;  %v697_v51 = vld [vmem:[#allocation5 + $0x198] sm:$0xff]  ;;  %v3628_v54 = vpack.c.bf16 %v698_v42, %v694_v41  ;;  %v3631_v57 = vpack.c.bf16 %v707_v46, %v703_v43  ;;  %v702_v58 = vld [vmem:[#allocation5 + $0x1c0] sm:$0xff]  ;;  %v3634_v61 = vpack.c.bf16 %v692_v50, %v688_v49  ;;  %v696_v0 = vld [vmem:[#allocation5 + $0x190] sm:$0xff] }
 0x158   : > { %2475 = vmatprep.subr.bf16.mxu1 %v3613_v34  ;;  %v701_v53 = vld [vmem:[#allocation5 + $0x1b8] sm:$0xff]  ;;  %v706_v59 = vld [vmem:[#allocation5 + $0x1e0] sm:$0xff]  ;;  %v700_v1 = vld [vmem:[#allocation5 + $0x1b0] sm:$0xff] }
 0x159   : > { %v3637_v62 = vpack.c.bf16 %v701_v53, %v697_v51  ;;  %v705_v2 = vld [vmem:[#allocation5 + $0x1d8] sm:$0xff]  ;;  %v3640_v5 = vpack.c.bf16 %v706_v59, %v702_v58  ;;  %v3644_v6 = vpack.c.bf16 %v700_v1, %v696_v0  ;;  %v704_v9 = vld [vmem:[#allocation5 + $0x1d0] sm:$0xff]  ;;  %v733_v31 = vld [vmem:[%s3692_s20 + $0x10] sm:$0xff] }
 0x15a   : > { %2445 = vmatpush1.bf16.msra.mxu0 %v3604_v21  ;;  %v709_v4 = vld [vmem:[#allocation5 + $0x1f8] sm:$0xff]  ;;  %v708_v10 = vld [vmem:[#allocation5 + $0x1f0] sm:$0xff]  ;;  %v734_v36 = vld [vmem:[%s3692_s20 + $0x18] sm:$0xff] }
 0x15b   : > { %2447 = vmatprep.subr.bf16.mxu0 %v3607_v24  ;;  %2477 = vmatpush1.bf16.msra.mxu1 %v3622_v45  ;;  %v3647_v7 = vpack.c.bf16 %v709_v4, %v705_v2  ;;  %v723_v13 = vld [vmem:[#allocation3] sm:$0xff]  ;;  %v3651_v15 = vpack.c.bf16 %v708_v10, %v704_v9  ;;  %v732_v17 = vld [vmem:[%s3692_s20 + $0x8] sm:$0xff] }
 0x15c   : > { %2479 = vmatprep.subr.bf16.mxu1 %v3625_v48  ;;  %v731_v16 = vld [vmem:[%s3692_s20] sm:$0xff]  ;;  %v724_v53 = vld [vmem:[#allocation4] sm:$0xff] }
 0x15e   : > { %2449 = vmatpush1.bf16.msra.mxu0 %v3616_v38 }
 0x15f   : > { %2451 = vmatprep.subr.bf16.mxu0 %v3619_v40  ;;  %2481 = vmatpush1.bf16.msra.mxu1 %v3634_v61 }
 0x160   : > { %2483 = vmatprep.subr.bf16.mxu1 %v3637_v62 }
 0x162   : > { %2453 = vmatpush1.bf16.msra.mxu0 %v3628_v54 }
 0x163   : > { %2455 = vmatprep.subr.bf16.mxu0 %v3631_v57  ;;  %2485 = vmatpush1.bf16.msra.mxu1 %v3644_v6 }
 0x164   : > { %2487 = vmatprep.subr.bf16.mxu1 %v3647_v7 }
 0x166   : > { %2457 = vmatpush1.bf16.msra.mxu0 %v3640_v5 }
 0x167   : > { %2491 = vmatprep.subr.bf16.mxu0 %v3557_v27  ;;  %2489 = vmatpush1.bf16.msra.mxu1 %v3651_v15 }
 0x168   : > { %2523 = vmatprep.subr.bf16.mxu1 %v3572_v52 }
 0x169   : > { %800 = vmatmul.mubr.f32.vlgmr.msra.gmra.mrb[0].mxu0 %v723_v13 }
 0x16a   : > { %2493 = vmatpush1.bf16.msra.mxu0 %v3561_v28  ;;  %977 = vmatprep.mubr.f32.mxu0 %v3299_v39 }
 0x16b   : > { %2495 = vmatprep.subr.bf16.mxu0 %v3563_v29  ;;  %871 = vmatmul.mubr.f32.vlgmr.msra.gmra.mrb[0].mxu1 %v723_v13 }
 0x16c   : > { %2525 = vmatpush1.bf16.msra.mxu1 %v3574_v55  ;;  %1048 = vmatprep.mubr.f32.mxu1 %v3299_v39 }
 0x16d   : > { %2527 = vmatprep.subr.bf16.mxu1 %v3584_v63 }
 0x16e   : > { %2497 = vmatpush1.bf16.msra.mxu0 %v3567_v44 }
 0x16f   : > { %2499 = vmatprep.subr.bf16.mxu0 %v3570_v47 }
 0x170   : > { %2529 = vmatpush1.bf16.msra.mxu1 %v3586_v3 }
 0x171   : > { %2531 = vmatprep.subr.bf16.mxu1 %v3592_v11 }
 0x172   : > { %2501 = vmatpush1.bf16.msra.mxu0 %v3577_v56 }
 0x173   : > { %2503 = vmatprep.subr.bf16.mxu0 %v3581_v60 }
 0x174   : > { %2533 = vmatpush1.bf16.msra.mxu1 %v3598_v14 }
 0x175   : > { %2535 = vmatprep.subr.bf16.mxu1 %v3601_v18 }
 0x176   : > { %2505 = vmatpush1.bf16.msra.mxu0 %v3590_v8 }
 0x177   : > { %2507 = vmatprep.subr.bf16.mxu0 %v3595_v12 }
 0x178   : > { %2537 = vmatpush1.bf16.msra.mxu1 %v3610_v32 }
 0x179   : > { %2539 = vmatprep.subr.bf16.mxu1 %v3613_v34 }
 0x17a   : > { %2509 = vmatpush1.bf16.msra.mxu0 %v3604_v21 }
 0x17b   : > { %2511 = vmatprep.subr.bf16.mxu0 %v3607_v24 }
 0x17c   : > { %2541 = vmatpush1.bf16.msra.mxu1 %v3622_v45 }
 0x17d   : > { %2543 = vmatprep.subr.bf16.mxu1 %v3625_v48 }
 0x17e   : > { %2513 = vmatpush1.bf16.msra.mxu0 %v3616_v38 }
 0x17f   : > { %2515 = vmatprep.subr.bf16.mxu0 %v3619_v40 }
 0x180   : > { %2545 = vmatpush1.bf16.msra.mxu1 %v3634_v61 }
 0x181   : > { %2547 = vmatprep.subr.bf16.mxu1 %v3637_v62 }
 0x182   : > { %2517 = vmatpush1.bf16.msra.mxu0 %v3628_v54 }
 0x183   : > { %2519 = vmatprep.subr.bf16.mxu0 %v3631_v57 }
 0x184   : > { %2549 = vmatpush1.bf16.msra.mxu1 %v3644_v6 }
 0x185   : > { %2551 = vmatprep.subr.bf16.mxu1 %v3647_v7 }
 0x186   : > { %2521 = vmatpush1.bf16.msra.mxu0 %v3640_v5 }
 0x187   : > { %2555 = vmatprep.subr.bf16.mxu0 %v3557_v27 }
 0x188   : > { %2553 = vmatpush1.bf16.msra.mxu1 %v3651_v15 }
 0x189   : > { %2587 = vmatprep.subr.bf16.mxu1 %v3572_v52 }
 0x23c   : > { %v801_v19 = vpop.f32.mrb[0].mxu0 }
 0x23d   : > { %v877_v20 = vadd.f32 %v801_v19, %v731_v16  ;;  %v803_v22 = vpop.f32.mrb[1].mxu0  ;;  %v2356_v16 = vld [vmem:[%s3692_s20 + $0x20] sm:$0xff] }
 0x23e   : > { %v878_v23 = vadd.f32 %v803_v22, %v732_v17  ;;  %v872_v33 = vpop.f32.mrb[0].mxu1  ;;  %v2357_v17 = vld [vmem:[%s3692_s20 + $0x28] sm:$0xff] }
 0x23f   : > { %v2353_v25 = vmul.f32 -1.442695, %v877_v20  ;;  %v874_v26 = vpop.f32.mrb[1].mxu1  ;;  %v879_v35 = vadd.f32 %v872_v33, %v733_v31 }
 0x240   : > { %v2354_v30 = vmul.f32 -1.442695, %v878_v23  ;;  %v880_v41 = vadd.f32 %v874_v26, %v734_v36  ;;  %v2358_v26 = vld [vmem:[%s3692_s20 + $0x30] sm:$0xff]  ;;  %v2359_v36 = vld [vmem:[%s3692_s20 + $0x38] sm:$0xff] }
 0x241   : > { %3014 = vpow2.f32 %v2353_v25  ;;  %v2355_v37 = vmul.f32 -1.442695, %v879_v35 }
 0x242   : > { %3016 = vpow2.f32 %v2354_v30 }
 0x243   : > { %3018 = vpow2.f32 %v2355_v37 }
 0x244   : > { %3020 = vtanh.f32 %v880_v41 }
 0x24b   : > { %v3015_v42 = vpop.eup %3014 }
 0x24c   : > { %v3017_v43 = vpop.eup %3016  ;;  %v890_v46 = vadd.f32 1.0, %v3015_v42 }
 0x24d   : > { %v891_v49 = vadd.f32 1.0, %v3017_v43  ;;  %v3019_v50 = vpop.eup %3018 }
 0x24e   : > { %3022 = vrcp.f32 %v890_v46  ;;  %v3021_v51 = vpop.eup %3020  ;;  %v892_v59 = vadd.f32 1.0, %v3019_v50 }
 0x24f   : > { %3024 = vrcp.f32 %v891_v49 }
 0x250   : > { %3026 = vrcp.f32 %v892_v59 }
 0x258   : > { %v3023_v58 = vpop.eup %3022 }
 0x259   : > { %v3025_v0 = vpop.eup %3024  ;;  %v901_v1 = vmul.f32 %v3023_v58, %v3021_v51 }
 0x25a   : > { %v900_v2 = vmul.f32 %v3025_v0, %v724_v53  ;;  %v3027_v9 = vpop.eup %3026 }
 0x25c   : > { %v3698_v4 = vadd.f32 %v901_v1, %v900_v2 }
 0x25e   : > { %3028 = vtanh.f32 %v3698_v4 }
 0x268   : > { %v3029_v10 = vpop.eup %3028 }
 0x269   : > { %v904_v13 = vmul.f32 %v3029_v10, %v3027_v9 }
 0x26b   : > { %905 = vst [vmem:[%s3449_s14] sm:$0xff] %v904_v13  ;;  %978 = vmatmul.mubr.f32.vlgmr.msra.gmra.mrb[2].mxu0 %v904_v13  ;;  %1049 = vmatmul.mubr.f32.vlgmr.msra.gmra.mrb[2].mxu1 %v904_v13 }
 0x26c   : > { %2557 = vmatpush1.bf16.msra.mxu0 %v3561_v28  ;;  %2589 = vmatpush1.bf16.msra.mxu1 %v3574_v55 }
 0x26d   : > { %2559 = vmatprep.subr.bf16.mxu0 %v3563_v29  ;;  %2591 = vmatprep.subr.bf16.mxu1 %v3584_v63 }
 0x26e   : > { %1156 = vmatprep.mubr.f32.mxu0 %v3299_v39  ;;  %1227 = vmatprep.mubr.f32.mxu1 %v3299_v39 }
 0x270   : > { %2561 = vmatpush1.bf16.msra.mxu0 %v3567_v44  ;;  %2593 = vmatpush1.bf16.msra.mxu1 %v3586_v3 }
 0x271   : > { %2563 = vmatprep.subr.bf16.mxu0 %v3570_v47  ;;  %2595 = vmatprep.subr.bf16.mxu1 %v3592_v11 }
 0x274   : > { %2565 = vmatpush1.bf16.msra.mxu0 %v3577_v56  ;;  %2597 = vmatpush1.bf16.msra.mxu1 %v3598_v14 }
 0x275   : > { %2567 = vmatprep.subr.bf16.mxu0 %v3581_v60  ;;  %2599 = vmatprep.subr.bf16.mxu1 %v3601_v18 }
 0x278   : > { %2569 = vmatpush1.bf16.msra.mxu0 %v3590_v8  ;;  %2601 = vmatpush1.bf16.msra.mxu1 %v3610_v32 }
 0x279   : > { %2571 = vmatprep.subr.bf16.mxu0 %v3595_v12  ;;  %2603 = vmatprep.subr.bf16.mxu1 %v3613_v34 }
 0x27c   : > { %2573 = vmatpush1.bf16.msra.mxu0 %v3604_v21  ;;  %2605 = vmatpush1.bf16.msra.mxu1 %v3622_v45 }
 0x27d   : > { %2575 = vmatprep.subr.bf16.mxu0 %v3607_v24  ;;  %2607 = vmatprep.subr.bf16.mxu1 %v3625_v48 }
 0x280   : > { %2577 = vmatpush1.bf16.msra.mxu0 %v3616_v38  ;;  %2609 = vmatpush1.bf16.msra.mxu1 %v3634_v61 }
 0x281   : > { %2579 = vmatprep.subr.bf16.mxu0 %v3619_v40  ;;  %2611 = vmatprep.subr.bf16.mxu1 %v3637_v62 }
 0x284   : > { %2581 = vmatpush1.bf16.msra.mxu0 %v3628_v54  ;;  %2613 = vmatpush1.bf16.msra.mxu1 %v3644_v6 }
 0x285   : > { %2583 = vmatprep.subr.bf16.mxu0 %v3631_v57  ;;  %2615 = vmatprep.subr.bf16.mxu1 %v3647_v7 }
 0x288   : > { %2585 = vmatpush1.bf16.msra.mxu0 %v3640_v5  ;;  %2617 = vmatpush1.bf16.msra.mxu1 %v3651_v15 }
 0x289   : > { %2619 = vmatprep.subr.bf16.mxu0 %v3557_v27  ;;  %2651 = vmatprep.subr.bf16.mxu1 %v3572_v52 }
 0x33e   : > { %v979_v19 = vpop.f32.mrb[2].mxu0  ;;  %v1050_v20 = vpop.f32.mrb[2].mxu1 }
 0x33f   : > { %v1055_v22 = vadd.f32 %v2356_v16, %v979_v19  ;;  %v981_v23 = vpop.f32.mrb[3].mxu0  ;;  %v1052_v25 = vpop.f32.mrb[3].mxu1  ;;  %v1057_v35 = vadd.f32 %v2358_v26, %v1050_v20  ;;  %v2365_v16 = vld [vmem:[%s3692_s20 + $0x48] sm:$0xff] }
 0x340   : > { %v1056_v30 = vadd.f32 %v2357_v17, %v981_v23  ;;  %v1058_v37 = vadd.f32 %v2359_v36, %v1052_v25 }
 0x341   : > { %v2360_v31 = vmul.f32 -1.442695, %v1055_v22  ;;  %v2362_v41 = vmul.f32 -1.442695, %v1057_v35  ;;  %v2367_v35 = vld [vmem:[%s3692_s20 + $0x58] sm:$0xff] }
 0x342   : > { %v2361_v33 = vmul.f32 -1.442695, %v1056_v30 }
 0x343   : > { %3030 = vpow2.f32 %v2360_v31 }
 0x344   : > { %3032 = vpow2.f32 %v2361_v33  ;;  %v2366_v33 = vld [vmem:[%s3692_s20 + $0x50] sm:$0xff] }
 0x345   : > { %3034 = vtanh.f32 %v1058_v37 }
 0x346   : > { %3036 = vpow2.f32 %v2362_v41 }
 0x34d   : > { %v3031_v42 = vpop.eup %3030 }
 0x34e   : > { %v1068_v43 = vadd.f32 1.0, %v3031_v42  ;;  %v3033_v46 = vpop.eup %3032 }
 0x34f   : > { %v1069_v49 = vadd.f32 1.0, %v3033_v46  ;;  %v3035_v50 = vpop.eup %3034 }
 0x350   : > { %3038 = vrcp.f32 %v1068_v43  ;;  %v3037_v51 = vpop.eup %3036 }
 0x351   : > { %3040 = vrcp.f32 %v1069_v49  ;;  %v1070_v0 = vadd.f32 1.0, %v3037_v51 }
 0x353   : > { %3042 = vrcp.f32 %v1070_v0 }
 0x35a   : > { %v3039_v53 = vpop.eup %3038 }
 0x35b   : > { %v1079_v58 = vmul.f32 %v3039_v53, %v3035_v50  ;;  %v3041_v59 = vpop.eup %3040 }
 0x35c   : > { %v1078_v1 = vmul.f32 %v3041_v59, %v3698_v4  ;;  %v2364_v4 = vld [vmem:[%s3692_s20 + $0x40] sm:$0xff] }
 0x35d   : > { %v3043_v9 = vpop.eup %3042 }
 0x35e   : > { %v3741_v2 = vadd.f32 %v1079_v58, %v1078_v1 }
 0x360   : > { %3044 = vtanh.f32 %v3741_v2 }
 0x36a   : > { %v3045_v10 = vpop.eup %3044 }
 0x36b   : > { %v1082_v13 = vmul.f32 %v3045_v10, %v3043_v9 }
 0x36d   : > { %2363 = vst [vmem:[%s3449_s14 + $0x8] sm:$0xff] %v1082_v13  ;;  %1157 = vmatmul.mubr.f32.vlgmr.msra.gmra.mrb[4].mxu0 %v1082_v13  ;;  %1228 = vmatmul.mubr.f32.vlgmr.msra.gmra.mrb[4].mxu1 %v1082_v13 }
 0x36e   : > { %2621 = vmatpush1.bf16.msra.mxu0 %v3561_v28  ;;  %2653 = vmatpush1.bf16.msra.mxu1 %v3574_v55 }
 0x36f   : > { %2623 = vmatprep.subr.bf16.mxu0 %v3563_v29  ;;  %2655 = vmatprep.subr.bf16.mxu1 %v3584_v63 }
 0x370   : > { %1335 = vmatprep.mubr.f32.mxu0 %v3299_v39  ;;  %1406 = vmatprep.mubr.f32.mxu1 %v3299_v39 }
 0x372   : > { %2625 = vmatpush1.bf16.msra.mxu0 %v3567_v44  ;;  %2657 = vmatpush1.bf16.msra.mxu1 %v3586_v3 }
 0x373   : > { %2627 = vmatprep.subr.bf16.mxu0 %v3570_v47  ;;  %2659 = vmatprep.subr.bf16.mxu1 %v3592_v11 }
 0x376   : > { %2629 = vmatpush1.bf16.msra.mxu0 %v3577_v56  ;;  %2661 = vmatpush1.bf16.msra.mxu1 %v3598_v14 }
 0x377   : > { %2631 = vmatprep.subr.bf16.mxu0 %v3581_v60  ;;  %2663 = vmatprep.subr.bf16.mxu1 %v3601_v18 }
 0x37a   : > { %2633 = vmatpush1.bf16.msra.mxu0 %v3590_v8  ;;  %2665 = vmatpush1.bf16.msra.mxu1 %v3610_v32 }
 0x37b   : > { %2635 = vmatprep.subr.bf16.mxu0 %v3595_v12  ;;  %2667 = vmatprep.subr.bf16.mxu1 %v3613_v34 }
 0x37e   : > { %2637 = vmatpush1.bf16.msra.mxu0 %v3604_v21  ;;  %2669 = vmatpush1.bf16.msra.mxu1 %v3622_v45 }
 0x37f   : > { %2639 = vmatprep.subr.bf16.mxu0 %v3607_v24  ;;  %2671 = vmatprep.subr.bf16.mxu1 %v3625_v48 }
 0x382   : > { %2641 = vmatpush1.bf16.msra.mxu0 %v3616_v38  ;;  %2673 = vmatpush1.bf16.msra.mxu1 %v3634_v61 }
 0x383   : > { %2643 = vmatprep.subr.bf16.mxu0 %v3619_v40  ;;  %2675 = vmatprep.subr.bf16.mxu1 %v3637_v62 }
 0x386   : > { %2645 = vmatpush1.bf16.msra.mxu0 %v3628_v54  ;;  %2677 = vmatpush1.bf16.msra.mxu1 %v3644_v6 }
 0x387   : > { %2647 = vmatprep.subr.bf16.mxu0 %v3631_v57  ;;  %2679 = vmatprep.subr.bf16.mxu1 %v3647_v7 }
 0x38a   : > { %2649 = vmatpush1.bf16.msra.mxu0 %v3640_v5  ;;  %2681 = vmatpush1.bf16.msra.mxu1 %v3651_v15 }
 0x38b   : > { %2683 = vmatprep.subr.bf16.mxu0 %v3557_v27  ;;  %2715 = vmatprep.subr.bf16.mxu1 %v3572_v52 }
 0x440   : > { %v1158_v17 = vpop.f32.mrb[4].mxu0  ;;  %v1229_v19 = vpop.f32.mrb[4].mxu1 }
 0x441   : > { %v1234_v20 = vadd.f32 %v2364_v4, %v1158_v17  ;;  %v1160_v22 = vpop.f32.mrb[5].mxu0  ;;  %v1231_v23 = vpop.f32.mrb[5].mxu1  ;;  %v1236_v26 = vadd.f32 %v2366_v33, %v1229_v19  ;;  %v2373_v4 = vld [vmem:[%s3692_s20 + $0x68] sm:$0xff] }
 0x442   : > { %v1235_v25 = vadd.f32 %v2365_v16, %v1160_v22  ;;  %v1237_v36 = vadd.f32 %v2367_v35, %v1231_v23 }
 0x443   : > { %v2368_v30 = vmul.f32 -1.442695, %v1234_v20  ;;  %v2370_v37 = vmul.f32 -1.442695, %v1236_v26  ;;  %v2375_v26 = vld [vmem:[%s3692_s20 + $0x78] sm:$0xff] }
 0x444   : > { %v2369_v31 = vmul.f32 -1.442695, %v1235_v25 }
 0x445   : > { %3046 = vpow2.f32 %v2368_v30 }
 0x446   : > { %3048 = vpow2.f32 %v2369_v31  ;;  %v2374_v31 = vld [vmem:[%s3692_s20 + $0x70] sm:$0xff] }
 0x447   : > { %3050 = vtanh.f32 %v1237_v36 }
 0x448   : > { %3052 = vpow2.f32 %v2370_v37 }
 0x44f   : > { %v3047_v41 = vpop.eup %3046 }
 0x450   : > { %v1247_v42 = vadd.f32 1.0, %v3047_v41  ;;  %v3049_v43 = vpop.eup %3048 }
 0x451   : > { %v1248_v46 = vadd.f32 1.0, %v3049_v43  ;;  %v3051_v49 = vpop.eup %3050 }
 0x452   : > { %3054 = vrcp.f32 %v1247_v42  ;;  %v3053_v50 = vpop.eup %3052 }
 0x453   : > { %3056 = vrcp.f32 %v1248_v46  ;;  %v1249_v59 = vadd.f32 1.0, %v3053_v50 }
 0x455   : > { %3058 = vrcp.f32 %v1249_v59 }
 0x45c   : > { %v3055_v51 = vpop.eup %3054 }
 0x45d   : > { %v1258_v53 = vmul.f32 %v3055_v51, %v3051_v49  ;;  %v3057_v58 = vpop.eup %3056 }
 0x45e   : > { %v1257_v0 = vmul.f32 %v3057_v58, %v3741_v2  ;;  %v2372_v2 = vld [vmem:[%s3692_s20 + $0x60] sm:$0xff] }
 0x45f   : > { %v3059_v9 = vpop.eup %3058 }
 0x460   : > { %v3784_v1 = vadd.f32 %v1258_v53, %v1257_v0 }
 0x462   : > { %3060 = vtanh.f32 %v3784_v1 }
 0x46c   : > { %v3061_v10 = vpop.eup %3060 }
 0x46d   : > { %v1261_v13 = vmul.f32 %v3061_v10, %v3059_v9 }
 0x46f   : > { %2371 = vst [vmem:[%s3449_s14 + $0x10] sm:$0xff] %v1261_v13  ;;  %1336 = vmatmul.mubr.f32.vlgmr.msra.gmra.mrb[6].mxu0 %v1261_v13  ;;  %1407 = vmatmul.mubr.f32.vlgmr.msra.gmra.mrb[6].mxu1 %v1261_v13 }
 0x470   : > { %2685 = vmatpush1.bf16.msra.mxu0 %v3561_v28  ;;  %2717 = vmatpush1.bf16.msra.mxu1 %v3574_v55 }
 0x471   : > { %2687 = vmatprep.subr.bf16.mxu0 %v3563_v29  ;;  %2719 = vmatprep.subr.bf16.mxu1 %v3584_v63 }
 0x472   : > { %1514 = vmatprep.mubr.f32.mxu0 %v3299_v39  ;;  %1585 = vmatprep.mubr.f32.mxu1 %v3299_v39 }
 0x474   : > { %2689 = vmatpush1.bf16.msra.mxu0 %v3567_v44  ;;  %2721 = vmatpush1.bf16.msra.mxu1 %v3586_v3 }
 0x475   : > { %2691 = vmatprep.subr.bf16.mxu0 %v3570_v47  ;;  %2723 = vmatprep.subr.bf16.mxu1 %v3592_v11 }
 0x478   : > { %2693 = vmatpush1.bf16.msra.mxu0 %v3577_v56  ;;  %2725 = vmatpush1.bf16.msra.mxu1 %v3598_v14 }
 0x479   : > { %2695 = vmatprep.subr.bf16.mxu0 %v3581_v60  ;;  %2727 = vmatprep.subr.bf16.mxu1 %v3601_v18 }
 0x47c   : > { %2697 = vmatpush1.bf16.msra.mxu0 %v3590_v8  ;;  %2729 = vmatpush1.bf16.msra.mxu1 %v3610_v32 }
 0x47d   : > { %2699 = vmatprep.subr.bf16.mxu0 %v3595_v12  ;;  %2731 = vmatprep.subr.bf16.mxu1 %v3613_v34 }
 0x480   : > { %2701 = vmatpush1.bf16.msra.mxu0 %v3604_v21  ;;  %2733 = vmatpush1.bf16.msra.mxu1 %v3622_v45 }
 0x481   : > { %2703 = vmatprep.subr.bf16.mxu0 %v3607_v24  ;;  %2735 = vmatprep.subr.bf16.mxu1 %v3625_v48 }
 0x484   : > { %2705 = vmatpush1.bf16.msra.mxu0 %v3616_v38  ;;  %2737 = vmatpush1.bf16.msra.mxu1 %v3634_v61 }
 0x485   : > { %2707 = vmatprep.subr.bf16.mxu0 %v3619_v40  ;;  %2739 = vmatprep.subr.bf16.mxu1 %v3637_v62 }
 0x488   : > { %2709 = vmatpush1.bf16.msra.mxu0 %v3628_v54  ;;  %2741 = vmatpush1.bf16.msra.mxu1 %v3644_v6 }
 0x489   : > { %2711 = vmatprep.subr.bf16.mxu0 %v3631_v57  ;;  %2743 = vmatprep.subr.bf16.mxu1 %v3647_v7 }
 0x48c   : > { %2713 = vmatpush1.bf16.msra.mxu0 %v3640_v5  ;;  %2745 = vmatpush1.bf16.msra.mxu1 %v3651_v15 }
 0x48d   : > { %2747 = vmatprep.subr.bf16.mxu0 %v3557_v27  ;;  %2779 = vmatprep.subr.bf16.mxu1 %v3572_v52 }
 0x542   : > { %v1337_v16 = vpop.f32.mrb[6].mxu0  ;;  %v1408_v17 = vpop.f32.mrb[6].mxu1 }
 0x543   : > { %v1413_v19 = vadd.f32 %v2372_v2, %v1337_v16  ;;  %v1339_v20 = vpop.f32.mrb[7].mxu0  ;;  %v1410_v22 = vpop.f32.mrb[7].mxu1  ;;  %v1415_v33 = vadd.f32 %v2374_v31, %v1408_v17  ;;  %v2381_v2 = vld [vmem:[%s3692_s20 + $0x88] sm:$0xff] }
 0x544   : > { %v1414_v23 = vadd.f32 %v2373_v4, %v1339_v20  ;;  %v1416_v35 = vadd.f32 %v2375_v26, %v1410_v22 }
 0x545   : > { %v2376_v25 = vmul.f32 -1.442695, %v1413_v19  ;;  %v2378_v36 = vmul.f32 -1.442695, %v1415_v33  ;;  %v2383_v33 = vld [vmem:[%s3692_s20 + $0x98] sm:$0xff] }
 0x546   : > { %v2377_v30 = vmul.f32 -1.442695, %v1414_v23 }
 0x547   : > { %3062 = vpow2.f32 %v2376_v25 }
 0x548   : > { %3064 = vpow2.f32 %v2377_v30  ;;  %v2382_v30 = vld [vmem:[%s3692_s20 + $0x90] sm:$0xff] }
 0x549   : > { %3066 = vtanh.f32 %v1416_v35 }
 0x54a   : > { %3068 = vpow2.f32 %v2378_v36 }
 0x551   : > { %v3063_v37 = vpop.eup %3062 }
 0x552   : > { %v1426_v41 = vadd.f32 1.0, %v3063_v37  ;;  %v3065_v42 = vpop.eup %3064 }
 0x553   : > { %v1427_v43 = vadd.f32 1.0, %v3065_v42  ;;  %v3067_v46 = vpop.eup %3066 }
 0x554   : > { %3070 = vrcp.f32 %v1426_v41  ;;  %v3069_v49 = vpop.eup %3068 }
 0x555   : > { %3072 = vrcp.f32 %v1427_v43  ;;  %v1428_v58 = vadd.f32 1.0, %v3069_v49 }
 0x557   : > { %3074 = vrcp.f32 %v1428_v58 }
 0x55e   : > { %v3071_v50 = vpop.eup %3070 }
 0x55f   : > { %v1437_v51 = vmul.f32 %v3071_v50, %v3067_v46  ;;  %v3073_v53 = vpop.eup %3072 }
 0x560   : > { %v1436_v59 = vmul.f32 %v3073_v53, %v3784_v1  ;;  %v2380_v1 = vld [vmem:[%s3692_s20 + $0x80] sm:$0xff] }
 0x561   : > { %v3075_v9 = vpop.eup %3074 }
 0x562   : > { %v3827_v0 = vadd.f32 %v1437_v51, %v1436_v59 }
 0x564   : > { %3076 = vtanh.f32 %v3827_v0 }
 0x56e   : > { %v3077_v10 = vpop.eup %3076 }
 0x56f   : > { %v1440_v13 = vmul.f32 %v3077_v10, %v3075_v9 }
 0x571   : > { %2379 = vst [vmem:[%s3449_s14 + $0x18] sm:$0xff] %v1440_v13  ;;  %1515 = vmatmul.mubr.f32.vlgmr.msra.gmra.mrb[8].mxu0 %v1440_v13  ;;  %1586 = vmatmul.mubr.f32.vlgmr.msra.gmra.mrb[8].mxu1 %v1440_v13 }
 0x572   : > { %2749 = vmatpush1.bf16.msra.mxu0 %v3561_v28  ;;  %2781 = vmatpush1.bf16.msra.mxu1 %v3574_v55 }
 0x573   : > { %2751 = vmatprep.subr.bf16.mxu0 %v3563_v29  ;;  %2783 = vmatprep.subr.bf16.mxu1 %v3584_v63 }
 0x574   : > { %1693 = vmatprep.mubr.f32.mxu0 %v3299_v39  ;;  %1764 = vmatprep.mubr.f32.mxu1 %v3299_v39 }
 0x576   : > { %2753 = vmatpush1.bf16.msra.mxu0 %v3567_v44  ;;  %2785 = vmatpush1.bf16.msra.mxu1 %v3586_v3 }
 0x577   : > { %2755 = vmatprep.subr.bf16.mxu0 %v3570_v47  ;;  %2787 = vmatprep.subr.bf16.mxu1 %v3592_v11 }
 0x57a   : > { %2757 = vmatpush1.bf16.msra.mxu0 %v3577_v56  ;;  %2789 = vmatpush1.bf16.msra.mxu1 %v3598_v14 }
 0x57b   : > { %2759 = vmatprep.subr.bf16.mxu0 %v3581_v60  ;;  %2791 = vmatprep.subr.bf16.mxu1 %v3601_v18 }
 0x57e   : > { %2761 = vmatpush1.bf16.msra.mxu0 %v3590_v8  ;;  %2793 = vmatpush1.bf16.msra.mxu1 %v3610_v32 }
 0x57f   : > { %2763 = vmatprep.subr.bf16.mxu0 %v3595_v12  ;;  %2795 = vmatprep.subr.bf16.mxu1 %v3613_v34 }
 0x582   : > { %2765 = vmatpush1.bf16.msra.mxu0 %v3604_v21  ;;  %2797 = vmatpush1.bf16.msra.mxu1 %v3622_v45 }
 0x583   : > { %2767 = vmatprep.subr.bf16.mxu0 %v3607_v24  ;;  %2799 = vmatprep.subr.bf16.mxu1 %v3625_v48 }
 0x586   : > { %2769 = vmatpush1.bf16.msra.mxu0 %v3616_v38  ;;  %2801 = vmatpush1.bf16.msra.mxu1 %v3634_v61 }
 0x587   : > { %2771 = vmatprep.subr.bf16.mxu0 %v3619_v40  ;;  %2803 = vmatprep.subr.bf16.mxu1 %v3637_v62 }
 0x58a   : > { %2773 = vmatpush1.bf16.msra.mxu0 %v3628_v54  ;;  %2805 = vmatpush1.bf16.msra.mxu1 %v3644_v6 }
 0x58b   : > { %2775 = vmatprep.subr.bf16.mxu0 %v3631_v57  ;;  %2807 = vmatprep.subr.bf16.mxu1 %v3647_v7 }
 0x58e   : > { %2777 = vmatpush1.bf16.msra.mxu0 %v3640_v5  ;;  %2809 = vmatpush1.bf16.msra.mxu1 %v3651_v15 }
 0x58f   : > { %2811 = vmatprep.subr.bf16.mxu0 %v3557_v27  ;;  %2843 = vmatprep.subr.bf16.mxu1 %v3572_v52 }
 0x644   : > { %v1516_v4 = vpop.f32.mrb[8].mxu0  ;;  %v1587_v16 = vpop.f32.mrb[8].mxu1 }
 0x645   : > { %v1592_v17 = vadd.f32 %v2380_v1, %v1516_v4  ;;  %v1518_v19 = vpop.f32.mrb[9].mxu0  ;;  %v1589_v20 = vpop.f32.mrb[9].mxu1  ;;  %v1594_v31 = vadd.f32 %v2382_v30, %v1587_v16  ;;  %v2389_v1 = vld [vmem:[%s3692_s20 + $0xa8] sm:$0xff] }
 0x646   : > { %v1593_v22 = vadd.f32 %v2381_v2, %v1518_v19  ;;  %v1595_v26 = vadd.f32 %v2383_v33, %v1589_v20 }
 0x647   : > { %v2384_v23 = vmul.f32 -1.442695, %v1592_v17  ;;  %v2386_v35 = vmul.f32 -1.442695, %v1594_v31  ;;  %v2391_v31 = vld [vmem:[%s3692_s20 + $0xb8] sm:$0xff] }
 0x648   : > { %v2385_v25 = vmul.f32 -1.442695, %v1593_v22 }
 0x649   : > { %3078 = vpow2.f32 %v2384_v23 }
 0x64a   : > { %3080 = vpow2.f32 %v2385_v25  ;;  %v2390_v25 = vld [vmem:[%s3692_s20 + $0xb0] sm:$0xff] }
 0x64b   : > { %3082 = vtanh.f32 %v1595_v26 }
 0x64c   : > { %3084 = vpow2.f32 %v2386_v35 }
 0x653   : > { %v3079_v36 = vpop.eup %3078 }
 0x654   : > { %v1605_v37 = vadd.f32 1.0, %v3079_v36  ;;  %v3081_v41 = vpop.eup %3080 }
 0x655   : > { %v1606_v42 = vadd.f32 1.0, %v3081_v41  ;;  %v3083_v43 = vpop.eup %3082 }
 0x656   : > { %3086 = vrcp.f32 %v1605_v37  ;;  %v3085_v46 = vpop.eup %3084 }
 0x657   : > { %3088 = vrcp.f32 %v1606_v42  ;;  %v1607_v53 = vadd.f32 1.0, %v3085_v46 }
 0x659   : > { %3090 = vrcp.f32 %v1607_v53 }
 0x660   : > { %v3087_v49 = vpop.eup %3086 }
 0x661   : > { %v1616_v50 = vmul.f32 %v3087_v49, %v3083_v43  ;;  %v3089_v51 = vpop.eup %3088 }
 0x662   : > { %v1615_v58 = vmul.f32 %v3089_v51, %v3827_v0  ;;  %v2388_v0 = vld [vmem:[%s3692_s20 + $0xa0] sm:$0xff] }
 0x663   : > { %v3091_v9 = vpop.eup %3090 }
 0x664   : > { %v3870_v59 = vadd.f32 %v1616_v50, %v1615_v58 }
 0x666   : > { %3092 = vtanh.f32 %v3870_v59 }
 0x670   : > { %v3093_v10 = vpop.eup %3092 }
 0x671   : > { %v1619_v13 = vmul.f32 %v3093_v10, %v3091_v9 }
 0x673   : > { %2387 = vst [vmem:[%s3449_s14 + $0x20] sm:$0xff] %v1619_v13  ;;  %1694 = vmatmul.mubr.f32.vlgmr.msra.gmra.mrb[10].mxu0 %v1619_v13  ;;  %1765 = vmatmul.mubr.f32.vlgmr.msra.gmra.mrb[10].mxu1 %v1619_v13 }
 0x674   : > { %2813 = vmatpush1.bf16.msra.mxu0 %v3561_v28  ;;  %2845 = vmatpush1.bf16.msra.mxu1 %v3574_v55 }
 0x675   : > { %2815 = vmatprep.subr.bf16.mxu0 %v3563_v29  ;;  %2847 = vmatprep.subr.bf16.mxu1 %v3584_v63 }
 0x676   : > { %1872 = vmatprep.mubr.f32.mxu0 %v3299_v39  ;;  %1943 = vmatprep.mubr.f32.mxu1 %v3299_v39 }
 0x678   : > { %2817 = vmatpush1.bf16.msra.mxu0 %v3567_v44  ;;  %2849 = vmatpush1.bf16.msra.mxu1 %v3586_v3 }
 0x679   : > { %2819 = vmatprep.subr.bf16.mxu0 %v3570_v47  ;;  %2851 = vmatprep.subr.bf16.mxu1 %v3592_v11 }
 0x67c   : > { %2821 = vmatpush1.bf16.msra.mxu0 %v3577_v56  ;;  %2853 = vmatpush1.bf16.msra.mxu1 %v3598_v14 }
 0x67d   : > { %2823 = vmatprep.subr.bf16.mxu0 %v3581_v60  ;;  %2855 = vmatprep.subr.bf16.mxu1 %v3601_v18 }
 0x680   : > { %2825 = vmatpush1.bf16.msra.mxu0 %v3590_v8  ;;  %2857 = vmatpush1.bf16.msra.mxu1 %v3610_v32 }
 0x681   : > { %2827 = vmatprep.subr.bf16.mxu0 %v3595_v12  ;;  %2859 = vmatprep.subr.bf16.mxu1 %v3613_v34 }
 0x684   : > { %2829 = vmatpush1.bf16.msra.mxu0 %v3604_v21  ;;  %2861 = vmatpush1.bf16.msra.mxu1 %v3622_v45 }
 0x685   : > { %2831 = vmatprep.subr.bf16.mxu0 %v3607_v24  ;;  %2863 = vmatprep.subr.bf16.mxu1 %v3625_v48 }
 0x688   : > { %2833 = vmatpush1.bf16.msra.mxu0 %v3616_v38  ;;  %2865 = vmatpush1.bf16.msra.mxu1 %v3634_v61 }
 0x689   : > { %2835 = vmatprep.subr.bf16.mxu0 %v3619_v40  ;;  %2867 = vmatprep.subr.bf16.mxu1 %v3637_v62 }
 0x68c   : > { %2837 = vmatpush1.bf16.msra.mxu0 %v3628_v54  ;;  %2869 = vmatpush1.bf16.msra.mxu1 %v3644_v6 }
 0x68d   : > { %2839 = vmatprep.subr.bf16.mxu0 %v3631_v57  ;;  %2871 = vmatprep.subr.bf16.mxu1 %v3647_v7 }
 0x690   : > { %2841 = vmatpush1.bf16.msra.mxu0 %v3640_v5  ;;  %2873 = vmatpush1.bf16.msra.mxu1 %v3651_v15 }
 0x691   : > { %2875 = vmatprep.subr.bf16.mxu0 %v3557_v27  ;;  %2907 = vmatprep.subr.bf16.mxu1 %v3572_v52 }
 0x746   : > { %v1695_v2 = vpop.f32.mrb[10].mxu0  ;;  %v1766_v4 = vpop.f32.mrb[10].mxu1 }
 0x747   : > { %v1771_v16 = vadd.f32 %v2388_v0, %v1695_v2  ;;  %v1697_v17 = vpop.f32.mrb[11].mxu0  ;;  %v1768_v19 = vpop.f32.mrb[11].mxu1  ;;  %v1773_v30 = vadd.f32 %v2390_v25, %v1766_v4 }
 0x748   : > { %v1772_v20 = vadd.f32 %v2389_v1, %v1697_v17  ;;  %v1774_v33 = vadd.f32 %v2391_v31, %v1768_v19  ;;  %v2406_v19 = vld [vmem:[%s3692_s20 + $0xf0] sm:$0xff] }
 0x749   : > { %v2392_v22 = vmul.f32 -1.442695, %v1771_v16  ;;  %v2394_v27 = vmul.f32 -1.442695, %v1773_v30 }
 0x74a   : > { %v2393_v23 = vmul.f32 -1.442695, %v1772_v20 }
 0x74b   : > { %3094 = vpow2.f32 %v2392_v22  ;;  %v2407_v22 = vld [vmem:[%s3692_s20 + $0xf8] sm:$0xff] }
 0x74c   : > { %3096 = vpow2.f32 %v2393_v23 }
 0x74d   : > { %3098 = vtanh.f32 %v1774_v33 }
 0x74e   : > { %3100 = vpow2.f32 %v2394_v27 }
 0x755   : > { %v3095_v26 = vpop.eup %3094 }
 0x756   : > { %v1784_v35 = vadd.f32 1.0, %v3095_v26  ;;  %v3097_v52 = vpop.eup %3096 }
 0x757   : > { %v1785_v36 = vadd.f32 1.0, %v3097_v52  ;;  %v3099_v37 = vpop.eup %3098 }
 0x758   : > { %3102 = vrcp.f32 %v1784_v35  ;;  %v3101_v41 = vpop.eup %3100 }
 0x759   : > { %3104 = vrcp.f32 %v1785_v36  ;;  %v1786_v49 = vadd.f32 1.0, %v3101_v41 }
 0x75b   : > { %3106 = vrcp.f32 %v1786_v49 }
 0x762   : > { %v3103_v42 = vpop.eup %3102 }
 0x763   : > { %v1795_v43 = vmul.f32 %v3103_v42, %v3099_v37  ;;  %v3105_v46 = vpop.eup %3104 }
 0x764   : > { %v1794_v50 = vmul.f32 %v3105_v46, %v3870_v59  ;;  %v2405_v59 = vld [vmem:[%s3692_s20 + $0xe8] sm:$0xff] }
 0x765   : > { %v3107_v53 = vpop.eup %3106 }
 0x766   : > { %v3913_v51 = vadd.f32 %v1795_v43, %v1794_v50 }
 0x768   : > { %3108 = vtanh.f32 %v3913_v51 }
 0x772   : > { %v3109_v58 = vpop.eup %3108 }
 0x773   : > { %v1798_v9 = vmul.f32 %v3109_v58, %v3107_v53 }
 0x775   : > { %2395 = vst [vmem:[%s3449_s14 + $0x28] sm:$0xff] %v1798_v9  ;;  %1873 = vmatmul.mubr.f32.vlgmr.msra.gmra.mrb[12].mxu0 %v1798_v9  ;;  %1944 = vmatmul.mubr.f32.vlgmr.msra.gmra.mrb[12].mxu1 %v1798_v9 }
 0x776   : > { %2877 = vmatpush1.bf16.msra.mxu0 %v3561_v28  ;;  %2909 = vmatpush1.bf16.msra.mxu1 %v3574_v55  ;;  %v2397_v28 = vld [vmem:[%s3692_s20 + $0xc8] sm:$0xff] }
 0x777   : > { %2879 = vmatprep.subr.bf16.mxu0 %v3563_v29  ;;  %2911 = vmatprep.subr.bf16.mxu1 %v3584_v63 }
 0x778   : > { %2051 = vmatprep.mubr.f32.mxu0 %v3299_v39  ;;  %2122 = vmatprep.mubr.f32.mxu1 %v3299_v39  ;;  %v2396_v39 = vld [vmem:[%s3692_s20 + $0xc0] sm:$0xff] }
 0x77a   : > { %2881 = vmatpush1.bf16.msra.mxu0 %v3567_v44  ;;  %2913 = vmatpush1.bf16.msra.mxu1 %v3586_v3 }
 0x77b   : > { %2883 = vmatprep.subr.bf16.mxu0 %v3570_v47  ;;  %2915 = vmatprep.subr.bf16.mxu1 %v3592_v11 }
 0x77e   : > { %2885 = vmatpush1.bf16.msra.mxu0 %v3577_v56  ;;  %2917 = vmatpush1.bf16.msra.mxu1 %v3598_v14 }
 0x77f   : > { %2887 = vmatprep.subr.bf16.mxu0 %v3581_v60  ;;  %2919 = vmatprep.subr.bf16.mxu1 %v3601_v18 }
 0x782   : > { %2889 = vmatpush1.bf16.msra.mxu0 %v3590_v8  ;;  %2921 = vmatpush1.bf16.msra.mxu1 %v3610_v32  ;;  %v2398_v8 = vld [vmem:[%s3692_s20 + $0xd0] sm:$0xff] }
 0x783   : > { %2891 = vmatprep.subr.bf16.mxu0 %v3595_v12  ;;  %2923 = vmatprep.subr.bf16.mxu1 %v3613_v34  ;;  %v2399_v12 = vld [vmem:[%s3692_s20 + $0xd8] sm:$0xff] }
 0x786   : > { %2893 = vmatpush1.bf16.msra.mxu0 %v3604_v21  ;;  %2925 = vmatpush1.bf16.msra.mxu1 %v3622_v45 }
 0x787   : > { %2895 = vmatprep.subr.bf16.mxu0 %v3607_v24  ;;  %2927 = vmatprep.subr.bf16.mxu1 %v3625_v48 }
 0x78a   : > { %2897 = vmatpush1.bf16.msra.mxu0 %v3616_v38  ;;  %2929 = vmatpush1.bf16.msra.mxu1 %v3634_v61 }
 0x78b   : > { %2899 = vmatprep.subr.bf16.mxu0 %v3619_v40  ;;  %2931 = vmatprep.subr.bf16.mxu1 %v3637_v62 }
 0x78e   : > { %2901 = vmatpush1.bf16.msra.mxu0 %v3628_v54  ;;  %2933 = vmatpush1.bf16.msra.mxu1 %v3644_v6 }
 0x78f   : > { %2903 = vmatprep.subr.bf16.mxu0 %v3631_v57  ;;  %2935 = vmatprep.subr.bf16.mxu1 %v3647_v7 }
 0x792   : > { %2905 = vmatpush1.bf16.msra.mxu0 %v3640_v5  ;;  %2937 = vmatpush1.bf16.msra.mxu1 %v3651_v15  ;;  %v2404_v15 = vld [vmem:[%s3692_s20 + $0xe0] sm:$0xff] }
 0x848   : > { %v1874_v29 = vpop.f32.mrb[12].mxu0  ;;  %v1945_v44 = vpop.f32.mrb[12].mxu1 }
 0x849   : > { %v1950_v47 = vadd.f32 %v2396_v39, %v1874_v29  ;;  %v1876_v55 = vpop.f32.mrb[13].mxu0  ;;  %v1947_v56 = vpop.f32.mrb[13].mxu1  ;;  %v1952_v11 = vadd.f32 %v2398_v8, %v1945_v44 }
 0x84a   : > { %v1951_v60 = vadd.f32 %v2397_v28, %v1876_v55  ;;  %v1953_v14 = vadd.f32 %v2399_v12, %v1947_v56 }
 0x84b   : > { %v2400_v63 = vmul.f32 -1.442695, %v1950_v47  ;;  %v2402_v18 = vmul.f32 -1.442695, %v1952_v11 }
 0x84c   : > { %v2401_v3 = vmul.f32 -1.442695, %v1951_v60 }
 0x84d   : > { %3110 = vpow2.f32 %v2400_v63 }
 0x84e   : > { %3112 = vpow2.f32 %v2401_v3 }
 0x84f   : > { %3114 = vtanh.f32 %v1953_v14 }
 0x850   : > { %3116 = vpow2.f32 %v2402_v18 }
 0x857   : > { %v3111_v21 = vpop.eup %3110 }
 0x858   : > { %v1963_v24 = vadd.f32 1.0, %v3111_v21  ;;  %v3113_v32 = vpop.eup %3112 }
 0x859   : > { %v1964_v34 = vadd.f32 1.0, %v3113_v32  ;;  %v3115_v38 = vpop.eup %3114 }
 0x85a   : > { %3118 = vrcp.f32 %v1963_v24  ;;  %v3117_v40 = vpop.eup %3116 }
 0x85b   : > { %3120 = vrcp.f32 %v1964_v34  ;;  %v1965_v57 = vadd.f32 1.0, %v3117_v40 }
 0x85d   : > { %3122 = vrcp.f32 %v1965_v57 }
 0x864   : > { %v3119_v45 = vpop.eup %3118 }
 0x865   : > { %v1974_v48 = vmul.f32 %v3119_v45, %v3115_v38  ;;  %v3121_v54 = vpop.eup %3120 }
 0x866   : > { %v1973_v61 = vmul.f32 %v3121_v54, %v3913_v51 }
 0x867   : > { %v3123_v5 = vpop.eup %3122 }
 0x868   : > { %v1975_v62 = vadd.f32 %v1974_v48, %v1973_v61 }
 0x86a   : > { %3124 = vtanh.f32 %v1975_v62 }
 0x874   : > { %v3125_v6 = vpop.eup %3124 }
 0x875   : > { %v1977_v7 = vmul.f32 %v3125_v6, %v3123_v5 }
 0x877   : > { %2403 = vst [vmem:[%s3449_s14 + $0x30] sm:$0xff] %v1977_v7  ;;  %2052 = vmatmul.mubr.f32.vlgmr.msra.gmra.mrb[14].mxu0 %v1977_v7  ;;  %2123 = vmatmul.mubr.f32.vlgmr.msra.gmra.mrb[14].mxu1 %v1977_v7 }
 0x94a   : > { %v2053_v10 = vpop.f32.mrb[14].mxu0  ;;  %v2124_v13 = vpop.f32.mrb[14].mxu1 }
 0x94b   : > { %v2129_v0 = vadd.f32 %v2404_v15, %v2053_v10  ;;  %v2055_v1 = vpop.f32.mrb[15].mxu0  ;;  %v2126_v2 = vpop.f32.mrb[15].mxu1  ;;  %v2131_v20 = vadd.f32 %v2406_v19, %v2124_v13 }
 0x94c   : > { %v2130_v4 = vadd.f32 %v2405_v59, %v2055_v1  ;;  %v2132_v23 = vadd.f32 %v2407_v22, %v2126_v2 }
 0x94d   : > { %v2408_v16 = vmul.f32 -1.442695, %v2129_v0  ;;  %v2410_v25 = vmul.f32 -1.442695, %v2131_v20 }
 0x94e   : > { %v2409_v17 = vmul.f32 -1.442695, %v2130_v4 }
 0x94f   : > { %3126 = vpow2.f32 %v2408_v16 }
 0x950   : > { %3128 = vpow2.f32 %v2409_v17 }
 0x951   : > { %3130 = vtanh.f32 %v2132_v23 }
 0x952   : > { %3132 = vpow2.f32 %v2410_v25 }
 0x959   : > { %v3127_v30 = vpop.eup %3126 }
 0x95a   : > { %v2142_v31 = vadd.f32 1.0, %v3127_v30  ;;  %v3129_v33 = vpop.eup %3128 }
 0x95b   : > { %v2143_v27 = vadd.f32 1.0, %v3129_v33  ;;  %v3131_v26 = vpop.eup %3130 }
 0x95c   : > { %3134 = vrcp.f32 %v2142_v31  ;;  %v3133_v35 = vpop.eup %3132 }
 0x95d   : > { %3136 = vrcp.f32 %v2143_v27  ;;  %v2144_v41 = vadd.f32 1.0, %v3133_v35 }
 0x95f   : > { %3138 = vrcp.f32 %v2144_v41 }
 0x966   : > { %v3135_v52 = vpop.eup %3134 }
 0x967   : > { %v2153_v36 = vmul.f32 %v3135_v52, %v3131_v26  ;;  %v3137_v37 = vpop.eup %3136 }
 0x968   : > { %v2152_v42 = vmul.f32 %v3137_v37, %v1975_v62 }
 0x969   : > { %v3139_v46 = vpop.eup %3138 }
 0x96a   : > { %v2154_v43 = vadd.f32 %v2153_v36, %v2152_v42 }
 0x96c   : > { %3140 = vtanh.f32 %v2154_v43  ;;  %2160 = vst [vmem:[#allocation4] sm:$0xff] %v2154_v43 }
 0x976   : > { %v3141_v49 = vpop.eup %3140 }
 0x977   : > { %v2156_v50 = vmul.f32 %v3141_v49, %v3139_v46 }
 0x979   : > { %2411 = vst [vmem:[%s3449_s14 + $0x38] sm:$0xff] %v2156_v50  ;;  %2159 = vst [vmem:[#allocation3] sm:$0xff] %v2156_v50 }
 0x97a PF: > { %p2412_p8 = scmp.ne.s32.totalorder %s3371_s9, 1 }
 0x97b   : > { %v2167_v53 = vld [vmem:[#allocation4] sm:$0xff] (!%p2412_p8) }
 0x97c   : > { %2164 = sbr.rel (%p2412_p8) target bundleno = 2435 (0x983), region = 64  ;;  %2168 = vst [vmem:[#allocation11] sm:$0xff] (!%p2412_p8), %v2167_v53 }
 0x980   : > { %v2165_v51 = vld [vmem:[#allocation3] sm:$0xff] (!%p2412_p8) }
 0x981   : > { %2166 = vst [vmem:[#allocation9] sm:$0xff] (!%p2412_p8), %v2165_v51 }
 0x983 PF: > { %s3300_s23 = smov [#allocation9]   ;;  %s2414_s24 = sadd.s32 4294967295, %s3371_s9 }
 0x984   : > { %s2200_s13 = sshll.u32 %s3300_s23, 4  ;;  %p3962_p10 = scmp.gt.s32.totalorder %s2414_s24, 0  ;;  %s2201_s13 = int_to_ptr.vmem [resolvable:$true] %s2200_s13 }
 0x985   : > { %s3170_s22 = scalar_lea.vmem %s2201_s13, 128  ;;  %p4082_p2 = scmp.eq.s32.totalorder %s3371_s9, 1 }
 0x986   : > { %p3171_p0 = scmp.ne.s32.totalorder %s2201_s13, %s3170_s22  ;;  %p3177_p5 = scmp.lt.s32.totalorder %s2201_s13, %s2201_s13 }
 0x987   : > { %p3178_p9 = scmp.lt.s32.totalorder %s3170_s22, %s3170_s22 }
 0x988   : > { %p3172_p6 = pnand %p3171_p0, %p4082_p2 }
 0x989   : > { %p3179_p11 = por %p3178_p9, %p3177_p5 }
 0x98a   : > { %p3173_p3 = pneg %p3172_p6 }
 0x98c   : > { %p3180_p12 = pnand %p3179_p11, %p3173_p3 }
 0x98e   : > { %3183 = shalt.err (!%p3180_p12)
}
 0x98f   : > { %s3184_s10 = scalar_lea.hbm %s4066_s7, 128  ;;  %p4083_p1 = pmov %p4082_p2 }
 0x990   : > { %p3185_p13 = scmp.ne.s32.totalorder %s4066_s7, %s3184_s10  ;;  %p3190_p8 = scmp.lt.u32.totalorder %s3184_s10, %s4066_s7 }
 0x992   : > { %p3186_p4 = pnand %p3185_p13, %p4083_p1 }
 0x994   : > { %p3187_p7 = pneg %p3186_p4 }
 0x996   : > { %p3192_p0 = pnand %p3190_p8, %p3187_p7 }
 0x998   : > { %3195 = shalt.err (!%p3192_p0)
}
 0x999   : > { %p4084_p2 = pmov %p4083_p1  ;;  %s4110_s24 = smov (!%p3962_p10, %s2414_s24), 0 }
 0x99a   : > { %s2186_s26 = sshll.u32 %s3449_s14, 4  ;;  %s2425_s19 = sshll.u32 %s4110_s24, 10  ;;  %s3987_s26 = int_to_ptr.vmem [resolvable:$true] %s2186_s26 }
 0x99b   : > { %2944 = dma.vmem_to_hbm [thread:$0]  (%p4084_p2), %s2201_s13, 128, %s4066_s7, [#allocation10]  }
 0x99c   : > { %s3992_s16 = scalar_lea.hbm %s4065_s6, %s2425_s19  ;;  %s4085_s25 = sand.u32 1, %s3284_s28  }
 0x99d   : > { %s3996_s20 = scalar_lea.sflag [#allocation7], %s4085_s25  ;;  %s3196_s23 = scalar_lea.vmem %s3987_s26, 1024 }
 0x99e   : > { %p3197_p6 = scmp.ne.s32.totalorder %s3987_s26, %s3196_s23  ;;  %p4086_p3 = scmp.ne.s32.totalorder %s4073_s15, 0 }
 0x99f   : > { %s3301_s14 = smov [#allocation8]  }
 0x9a0   : > { %p3198_p5 = pnand %p3197_p6, %p4086_p3  ;;  %s3200_s13 = sshll.u32 %s3301_s14, 4  ;;  %s3201_s13 = int_to_ptr.vmem [resolvable:$false] %s3200_s13 }
 0x9a1   : > { %s3202_s24 = scalar_lea.vmem %s3201_s13, 2048  ;;  %p3203_p9 = scmp.lt.s32.totalorder %s3987_s26, %s3201_s13 }
 0x9a2   : > { %p3199_p10 = pneg %p3198_p5  ;;  %p3204_p11 = scmp.lt.s32.totalorder %s3202_s24, %s3196_s23 }
 0x9a4   : > { %p3205_p12 = por %p3204_p11, %p3203_p9 }
 0x9a6   : > { %p3206_p13 = pnand %p3205_p12, %p3199_p10 }
 0x9a8   : > { %3209 = shalt.err (!%p3206_p13)
}
 0x9a9   : > { %s3210_s21 = scalar_lea.hbm %s3992_s16, 1024  ;;  %s3214_s12 = scalar_lea.hbm %s4065_s6, 1024 }
 0x9aa   : > { %p3211_p1 = scmp.ne.s32.totalorder %s3992_s16, %s3210_s21  ;;  %p3215_p8 = scmp.lt.u32.totalorder %s3992_s16, %s4065_s6 }
 0x9ab   : > { %p3216_p0 = scmp.lt.u32.totalorder %s3214_s12, %s3210_s21  ;;  %p3218_p6 = scmp.lt.u32.totalorder %s3210_s21, %s3992_s16 }
 0x9ac   : > { %p3212_p4 = pnand %p3211_p1, %p4086_p3 }
 0x9ad   : > { %p3217_p2 = por %p3216_p0, %p3215_p8 }
 0x9ae   : > { %p3213_p7 = pneg %p3212_p4 }
 0x9af   : > { %p3219_p5 = por %p3218_p6, %p3217_p2 }
 0x9b1   : > { %p3220_p10 = pnand %p3219_p5, %p3213_p7 }
 0x9b3   : > { %3223 = shalt.err (!%p3220_p10)
}
 0x9b4   : > { %s3302_s23 = smov 128   ;;  %s3303_s14 = smov 8  }
 0x9b5   : > { %2942 = dma.vmem_to_hbm [thread:$0]  (%p4086_p3), %s3987_s26, 1024, %s3992_s16, %s3996_s20, %s3302_s23, %s3302_s23, %s3303_s14  }
 0x9b6   : > { %s3304_s13 = smov [#allocation11]   ;;  %p4087_p11 = scmp.eq.s32.totalorder %s3371_s9, 1 }
 0x9b7   : > { %s2211_s24 = sshll.u32 %s3304_s13, 4  ;;  %s2212_s24 = int_to_ptr.vmem [resolvable:$true] %s2211_s24 }
 0x9b8   : > { %s3224_s22 = scalar_lea.vmem %s2212_s24, 128  ;;  %p3231_p1 = scmp.lt.s32.totalorder %s2212_s24, %s2212_s24 }
 0x9b9   : > { %p3225_p9 = scmp.ne.s32.totalorder %s2212_s24, %s3224_s22  ;;  %p3232_p4 = scmp.lt.s32.totalorder %s3224_s22, %s3224_s22 }
 0x9bb   : > { %p3226_p12 = pnand %p3225_p9, %p4087_p11  ;;  %p3233_p7 = por %p3232_p4, %p3231_p1 }
 0x9bd   : > { %p3227_p13 = pneg %p3226_p12 }
 0x9bf   : > { %p3234_p8 = pnand %p3233_p7, %p3227_p13 }
 0x9c1   : > { %3237 = shalt.err (!%p3234_p8)
}
 0x9c2   : > { %s3238_s12 = scalar_lea.hbm %s4067_s8, 128  ;;  %p4088_p0 = pmov %p4087_p11 }
 0x9c3   : > { %p3239_p3 = scmp.ne.s32.totalorder %s4067_s8, %s3238_s12  ;;  %p3244_p5 = scmp.lt.u32.totalorder %s3238_s12, %s4067_s8 }
 0x9c5   : > { %p3240_p2 = pnand %p3239_p3, %p4088_p0 }
 0x9c7   : > { %p3241_p6 = pneg %p3240_p2 }
 0x9c9   : > { %p3246_p10 = pnand %p3244_p5, %p3241_p6 }
 0x9cb   : > { %3249 = shalt.err (!%p3246_p10)
}
 0x9cc   : > { %p4089_p9 = pmov %p4088_p0  ;;  %p4090_p11 = pmov %p4088_p0 }
 0x9ce   : > { %2946 = dma.vmem_to_hbm [thread:$0]  (%p4089_p9), %s2212_s24, 128, %s4067_s8, [#allocation10]  }
 0x9cf   : > { %3271 = dma.done.wait (%p4090_p11), [#allocation10], 256   ;;  %p4091_p12 = pmov %p4088_p0 }
 0x9d1   : > { %3273 = vsyncadd (%p4091_p12), [#allocation10], 4294967040 }
 0x9d2 PF: > { %p2966_p13 = scmp.ge.s32.totalorder %s3292_s30, 2  ;;  %s2231_s23 = sand.u32 1, %s3280_s27  }
 0x9d3   : > { %p4092_p1 = scmp.ne.s32.totalorder %s4074_s17, 0  ;;  %s2232_s14 = scalar_lea.sflag [#allocation7], %s2231_s23 }
 0x9d5   : > { %p2957_p4 = pnand %p2966_p13, %p4092_p1 }
 0x9d7   : > { %3275 = dma.done.wait (!%p2957_p4), %s2232_s14, 1024  }
 0x9d8   : > { %3277 = vsyncadd (!%p2957_p4), %s2232_s14, 4294966272  ;;  %p21_p7 = scmp.ge.s32.totalorder %s3375_s11, 4   ;;  %s4093_s27 = smov %s3284_s28 }
 0x9d9   : > { %s4094_s28 = smov %s3288_s29  ;;  %s4095_s29 = smov %s3400_s18 }
 0x9da   : > { %s4096_s30 = smov %s3375_s11  ;;  %23 = sbr.rel (!%p21_p7) target bundleno = 5 (0x5), region = 133 }
 0x9e1   :  { %2237 = vsyncpa [#allocation6], 1 }
 0x9e2   :  { %2239 = vsyncpa [#allocation6 + $0x1], 1 }
 0x9e3   :  { %2240 = vsyncpa [#allocation7], 1 }
 0x9e4   :  { %2242 = vsyncpa [#allocation7 + $0x1], 1 }
 0x9e5   :  { %2243 = vsyncpa [#allocation10], 1 }

</bundles_post_ra>
